<compile_context>
chip_gen: v5e
topology: v5e:2x2
jax: 0.10.0
libtpu: 0.0.40
codegen_flags: <defaults>
</compile_context>

<pallas_src>
import jax
import jax.numpy as jnp
from jax.experimental import pallas as pl
from jax.experimental.pallas import tpu as pltpu

DMODEL = 256
WORD_LEN = 8            # T (the registered tril buffer forces T == WORD_LEN)
DHEAD = 64
N_HEADS = 2
DH = DHEAD // N_HEADS   # per-head dim = 32
LN_EPS = 1e-5
MAX_ROWS_PER_TILE = 256  # target MXU rows per grid step


def _layernorm(v, g, b):
    mu = jnp.mean(v, axis=-1, keepdims=True)
    var = jnp.mean((v - mu) ** 2, axis=-1, keepdims=True)
    return (v - mu) * jax.lax.rsqrt(var + LN_EPS) * g + b


def block_kernel(x_ref,
                 ln1g_ref, ln1b_ref,
                 wqkv_ref, bqkv_ref,
                 wo_ref, bo_ref,
                 ln2g_ref, ln2b_ref,
                 w1_ref, b1_ref, w2_ref, b2_ref,
                 o_ref):
    bt, T, D = x_ref.shape          # (B_TILE, T, DMODEL)
    R = bt * T

    # Flatten the row-tile: LN / QKV / MLP run on (R, D). The reshape merges
    # leading dims with the lane dim untouched -> layout-free.
    x = x_ref[...].reshape(R, D)

    # ---- ln1 + fused QKV projection (one N=192 matmul instead of three N=64) ----
    h = _layernorm(x, ln1g_ref[...], ln1b_ref[...])
    qkv = jnp.dot(h, wqkv_ref[...], preferred_element_type=jnp.float32) + bqkv_ref[...]
    q = qkv[:, :DHEAD] * (DH ** -0.5)          # fold 1/sqrt(DH) into q once
    k = qkv[:, DHEAD:2 * DHEAD]
    v = qkv[:, 2 * DHEAD:]

    row = jax.lax.broadcasted_iota(jnp.int32, (T, T), 0)
    col = jax.lax.broadcasted_iota(jnp.int32, (T, T), 1)
    causal = (row >= col)[None]                # (1, T, T), == tril != 0

    wo = wo_ref[...]                           # (DHEAD, DMODEL)

    # ---- multi-head causal attention, batched over the tile's batch dim ----
    # Static unroll over N_HEADS=2; output projection is accumulated per head,
    # so no lane-concat of the 32-wide head outputs is needed.
    proj = bo_ref[...]                         # (1, D), broadcasts up
    for hd in range(N_HEADS):
        lo, hi = hd * DH, (hd + 1) * DH
        qh = q[:, lo:hi].reshape(bt, T, DH)
        kh = k[:, lo:hi].reshape(bt, T, DH)
        vh = v[:, lo:hi].reshape(bt, T, DH)

        s = jnp.einsum('btd,bsd->bts', qh, kh,
                       preferred_element_type=jnp.float32)      # (bt, T, T)
        s = jnp.where(causal, s, -jnp.inf)     # safe: diagonal always unmasked
        s = s - jnp.max(s, axis=-1, keepdims=True)
        p = jnp.exp(s)
        p = p * pl.reciprocal(jnp.sum(p, axis=-1, keepdims=True), approx=True)
        # TODO(synk): attention-weight dropout skipped (eval mode -> identity)

        ah = jnp.einsum('bts,bsd->btd', p, vh,
                        preferred_element_type=jnp.float32).reshape(R, DH)
        proj = proj + jnp.dot(ah, wo[lo:hi, :],
                              preferred_element_type=jnp.float32)

    x1 = x + proj                              # residual 1 (proj dropout = identity)

    # ---- ln2 + feed-forward ----
    h2 = _layernorm(x1, ln2g_ref[...], ln2b_ref[...])
    f = jnp.dot(h2, w1_ref[...], preferred_element_type=jnp.float32) + b1_ref[...]
    f = jnp.maximum(f, 0.0)
    f = jnp.dot(f, w2_ref[...], preferred_element_type=jnp.float32) + b2_ref[...]
    # TODO(synk): FeedForward dropout skipped (eval mode -> identity)

    o_ref[...] = (x1 + f).reshape(bt, T, D)    # residual 2


def _batch_tile(B, T):
    """Largest divisor of B such that B_TILE * T <= MAX_ROWS_PER_TILE."""
    target = max(1, MAX_ROWS_PER_TILE // T)
    bt = 1
    for d in range(1, B + 1):
        if B % d == 0 and d <= target:
            bt = d
    return bt


def _full_spec(arr):
    zeros = (0,) * arr.ndim
    return pl.BlockSpec(arr.shape, lambda i: zeros)


def block_forward(x, params):
    B, T, D = x.shape
    assert T == WORD_LEN and D == DMODEL

    # Host-side (free) weight packing: fuse q/k/v into one matmul.
    wqkv = jnp.concatenate([params["wq"], params["wk"], params["wv"]], axis=1)  # (D, 192)
    bqkv = jnp.concatenate([params["bq"], params["bk"], params["bv"]], axis=1)  # (1, 192)

    weights = [params["ln1_g"], params["ln1_b"],
               wqkv, bqkv,
               params["wo"], params["bo"],
               params["ln2_g"], params["ln2_b"],
               params["w1"], params["b1"], params["w2"], params["b2"]]

    b_tile = _batch_tile(B, T)         # B=2, T=8 -> b_tile=2 -> single grid step
    grid = (B // b_tile,)

    return pl.pallas_call(
        block_kernel,
        out_shape=jax.ShapeDtypeStruct((B, T, D), jnp.float32),
        grid_spec=pltpu.PrefetchScalarGridSpec(
            num_scalar_prefetch=0,
            grid=grid,
            in_specs=[pl.BlockSpec((b_tile, T, D), lambda i: (i, 0, 0))]
                     + [_full_spec(w) for w in weights],
            out_specs=pl.BlockSpec((b_tile, T, D), lambda i: (i, 0, 0)),
        ),
        compiler_params=pltpu.CompilerParams(
            dimension_semantics=("parallel",)),
    )(x, *weights)


def init_params(key):
    ks = jax.random.split(key, 8)
    s = 0.02
    f32 = jnp.float32
    params = {
        # LayerNorms: PyTorch default gamma=1, beta=0
        "ln1_g": jnp.ones((1, DMODEL), f32),
        "ln1_b": jnp.zeros((1, DMODEL), f32),
        "ln2_g": jnp.ones((1, DMODEL), f32),
        "ln2_b": jnp.zeros((1, DMODEL), f32),
        # Attention q/k/v: heads stacked along output dim, stored (in, out)
        "wq": s * jax.random.normal(ks[0], (DMODEL, DHEAD), f32),
        "wk": s * jax.random.normal(ks[1], (DMODEL, DHEAD), f32),
        "wv": s * jax.random.normal(ks[2], (DMODEL, DHEAD), f32),
        "bq": s * jax.random.normal(ks[3], (1, DHEAD), f32),
        "bk": jnp.zeros((1, DHEAD), f32),
        "bv": jnp.zeros((1, DHEAD), f32),
        # Output projection of multi-head attention
        "wo": s * jax.random.normal(ks[4], (DHEAD, DMODEL), f32),
        "bo": jnp.zeros((1, DMODEL), f32),
        # FeedForward
        "w1": s * jax.random.normal(ks[5], (DMODEL, 4 * DMODEL), f32),
        "b1": s * jax.random.normal(ks[6], (1, 4 * DMODEL), f32),
        "w2": s * jax.random.normal(ks[7], (4 * DMODEL, DMODEL), f32),
        "b2": jnp.zeros((1, DMODEL), f32),
    }
    return params


def block_reference(x, p):
    """Plain-JAX reference mirroring the PyTorch forward (eval mode)."""
    def ln(v, g, b):
        mu = v.mean(-1, keepdims=True)
        var = ((v - mu) ** 2).mean(-1, keepdims=True)
        return (v - mu) / jnp.sqrt(var + LN_EPS) * g + b

    h = ln(x, p["ln1_g"], p["ln1_b"])
    q = h @ p["wq"] + p["bq"]
    k = h @ p["wk"] + p["bk"]
    v = h @ p["wv"] + p["bv"]
    T = x.shape[1]
    mask = jnp.tril(jnp.ones((T, T), bool))
    outs = []
    for hd in range(N_HEADS):
        qh, kh, vh = (a[..., hd * DH:(hd + 1) * DH] for a in (q, k, v))
        s = jnp.einsum("btd,bsd->bts", qh, kh) / (DH ** 0.5)
        s = jnp.where(mask, s, -jnp.inf)
        w = jax.nn.softmax(s, axis=-1)
        outs.append(jnp.einsum("bts,bsd->btd", w, vh))
    att = jnp.concatenate(outs, -1) @ p["wo"] + p["bo"]
    x1 = x + att
    h2 = ln(x1, p["ln2_g"], p["ln2_b"])
    f = jnp.maximum(h2 @ p["w1"] + p["b1"], 0.0) @ p["w2"] + p["b2"]
    return x1 + f


if __name__ == "__main__":
    key = jax.random.PRNGKey(0)
    kx, kp = jax.random.split(key)
    B = 2
    x = jax.random.normal(kx, (B, WORD_LEN, DMODEL), jnp.float32)
    params = init_params(kp)

    out = jax.block_until_ready(block_forward(x, params))
    ref = block_reference(x, params)

    assert out.shape == (B, WORD_LEN, DMODEL)
    # Tolerance slightly relaxed vs 1e-4 because the softmax denominator uses
    # the EUP approx reciprocal; everything else stays in f32.
    assert jnp.allclose(out, ref, atol=1e-3, rtol=1e-3), "mismatch vs reference"

    print("KERNEL_OK")
</pallas_src>

<mosaic_0001>
module attributes {stable_mosaic.version = 11 : i64} {
  func.func @block_kernel(%arg0: i32, %arg1: memref<2x8x256xf32, #tpu.memory_space<vmem>>, %arg2: memref<1x256xf32, #tpu.memory_space<vmem>>, %arg3: memref<1x256xf32, #tpu.memory_space<vmem>>, %arg4: memref<256x192xf32, #tpu.memory_space<vmem>>, %arg5: memref<1x192xf32, #tpu.memory_space<vmem>>, %arg6: memref<64x256xf32, #tpu.memory_space<vmem>>, %arg7: memref<1x256xf32, #tpu.memory_space<vmem>>, %arg8: memref<1x256xf32, #tpu.memory_space<vmem>>, %arg9: memref<1x256xf32, #tpu.memory_space<vmem>>, %arg10: memref<256x1024xf32, #tpu.memory_space<vmem>>, %arg11: memref<1x1024xf32, #tpu.memory_space<vmem>>, %arg12: memref<1024x256xf32, #tpu.memory_space<vmem>>, %arg13: memref<1x256xf32, #tpu.memory_space<vmem>>, %arg14: memref<2x8x256xf32, #tpu.memory_space<vmem>>) attributes {dimension_semantics = [#tpu.dimension_semantics<parallel>], iteration_bounds = array<i64: 1>, scalar_prefetch = 0 : i64, scratch_operands = 0 : i64, tpu.core_type = #tpu.core_type<tc>, window_params = [{transform_indices = @transform_0, window_bounds = array<i64: 2, 8, 256>}, {pipeline_mode = #tpu.pipeline_mode<synchronous>, transform_indices = @transform_1, window_bounds = array<i64: 1, 256>}, {pipeline_mode = #tpu.pipeline_mode<synchronous>, transform_indices = @transform_2, window_bounds = array<i64: 1, 256>}, {pipeline_mode = #tpu.pipeline_mode<synchronous>, transform_indices = @transform_3, window_bounds = array<i64: 256, 192>}, {pipeline_mode = #tpu.pipeline_mode<synchronous>, transform_indices = @transform_4, window_bounds = array<i64: 1, 192>}, {pipeline_mode = #tpu.pipeline_mode<synchronous>, transform_indices = @transform_5, window_bounds = array<i64: 64, 256>}, {pipeline_mode = #tpu.pipeline_mode<synchronous>, transform_indices = @transform_6, window_bounds = array<i64: 1, 256>}, {pipeline_mode = #tpu.pipeline_mode<synchronous>, transform_indices = @transform_7, window_bounds = array<i64: 1, 256>}, {pipeline_mode = #tpu.pipeline_mode<synchronous>, transform_indices = @transform_8, window_bounds = array<i64: 1, 256>}, {pipeline_mode = #tpu.pipeline_mode<synchronous>, transform_indices = @transform_9, window_bounds = array<i64: 256, 1024>}, {pipeline_mode = #tpu.pipeline_mode<synchronous>, transform_indices = @transform_10, window_bounds = array<i64: 1, 1024>}, {pipeline_mode = #tpu.pipeline_mode<synchronous>, transform_indices = @transform_11, window_bounds = array<i64: 1024, 256>}, {pipeline_mode = #tpu.pipeline_mode<synchronous>, transform_indices = @transform_12, window_bounds = array<i64: 1, 256>}, {transform_indices = @transform_13, window_bounds = array<i64: 2, 8, 256>}]} {
    %c0 = arith.constant 0 : index
    %c0_0 = arith.constant 0 : index
    %c0_1 = arith.constant 0 : index
    %0 = vector.load %arg1[%c0, %c0_0, %c0_1] : memref<2x8x256xf32, #tpu.memory_space<vmem>>, vector<2x8x256xf32>
    %1 = vector.shape_cast %0 : vector<2x8x256xf32> to vector<16x256xf32>
    %c0_2 = arith.constant 0 : index
    %c0_3 = arith.constant 0 : index
    %2 = vector.load %arg2[%c0_2, %c0_3] : memref<1x256xf32, #tpu.memory_space<vmem>>, vector<1x256xf32>
    %c0_4 = arith.constant 0 : index
    %c0_5 = arith.constant 0 : index
    %3 = vector.load %arg3[%c0_4, %c0_5] : memref<1x256xf32, #tpu.memory_space<vmem>>, vector<1x256xf32>
    %cst = arith.constant dense<0.000000e+00> : vector<16xf32>
    %4 = vector.multi_reduction <add>, %1, %cst [1] : vector<16x256xf32> to vector<16xf32>
    %5 = vector.shape_cast %4 : vector<16xf32> to vector<16x1xf32>
    %cst_6 = arith.constant 2.560000e+02 : f32
    %6 = vector.broadcast %cst_6 : f32 to vector<16x1xf32>
    %7 = arith.divf %5, %6 : vector<16x1xf32>
    %8 = vector.broadcast %7 : vector<16x1xf32> to vector<16x256xf32>
    %9 = arith.subf %1, %8 : vector<16x256xf32>
    %10 = arith.mulf %9, %9 : vector<16x256xf32>
    %cst_7 = arith.constant dense<0.000000e+00> : vector<16xf32>
    %11 = vector.multi_reduction <add>, %10, %cst_7 [1] : vector<16x256xf32> to vector<16xf32>
    %12 = vector.shape_cast %11 : vector<16xf32> to vector<16x1xf32>
    %cst_8 = arith.constant 2.560000e+02 : f32
    %13 = vector.broadcast %cst_8 : f32 to vector<16x1xf32>
    %14 = arith.divf %12, %13 : vector<16x1xf32>
    %15 = vector.broadcast %7 : vector<16x1xf32> to vector<16x256xf32>
    %16 = arith.subf %1, %15 : vector<16x256xf32>
    %cst_9 = arith.constant 9.99999974E-6 : f32
    %17 = vector.broadcast %cst_9 : f32 to vector<16x1xf32>
    %18 = arith.addf %14, %17 : vector<16x1xf32>
    %19 = math.rsqrt %18 : vector<16x1xf32>
    %20 = vector.broadcast %19 : vector<16x1xf32> to vector<16x256xf32>
    %21 = arith.mulf %16, %20 : vector<16x256xf32>
    %22 = vector.broadcast %2 : vector<1x256xf32> to vector<16x256xf32>
    %23 = arith.mulf %21, %22 : vector<16x256xf32>
    %24 = vector.broadcast %3 : vector<1x256xf32> to vector<16x256xf32>
    %25 = arith.addf %23, %24 : vector<16x256xf32>
    %c0_10 = arith.constant 0 : index
    %c0_11 = arith.constant 0 : index
    %26 = vector.load %arg4[%c0_10, %c0_11] : memref<256x192xf32, #tpu.memory_space<vmem>>, vector<256x192xf32>
    %cst_12 = arith.constant dense<0.000000e+00> : vector<16x192xf32>
    %27 = tpu.matmul %25, %26, %cst_12 {dimension_numbers = #tpu.dot_dimension_numbers<[1], [0], [0], [1], [0, 0, 1, 1], [], []>} : vector<16x256xf32>, vector<256x192xf32>, vector<16x192xf32> -> vector<16x192xf32>
    %c0_13 = arith.constant 0 : index
    %c0_14 = arith.constant 0 : index
    %28 = vector.load %arg5[%c0_13, %c0_14] : memref<1x192xf32, #tpu.memory_space<vmem>>, vector<1x192xf32>
    %29 = vector.broadcast %28 : vector<1x192xf32> to vector<16x192xf32>
    %30 = arith.addf %27, %29 : vector<16x192xf32>
    %31 = vector.extract_strided_slice %30 {offsets = [0, 0], sizes = [16, 64], strides = [1, 1]} : vector<16x192xf32> to vector<16x64xf32>
    %cst_15 = arith.constant 0.176776692 : f32
    %32 = vector.broadcast %cst_15 : f32 to vector<16x64xf32>
    %33 = arith.mulf %31, %32 : vector<16x64xf32>
    %34 = vector.extract_strided_slice %30 {offsets = [0, 64], sizes = [16, 64], strides = [1, 1]} : vector<16x192xf32> to vector<16x64xf32>
    %35 = vector.extract_strided_slice %30 {offsets = [0, 128], sizes = [16, 64], strides = [1, 1]} : vector<16x192xf32> to vector<16x64xf32>
    %36 = tpu.iota {dimensions = array<i32: 0>} : vector<8x8xi32>
    %37 = tpu.iota {dimensions = array<i32: 1>} : vector<8x8xi32>
    %38 = arith.cmpi sge, %36, %37 : vector<8x8xi32>
    %39 = vector.shape_cast %38 : vector<8x8xi1> to vector<1x8x8xi1>
    %c0_16 = arith.constant 0 : index
    %c0_17 = arith.constant 0 : index
    %40 = vector.load %arg6[%c0_16, %c0_17] : memref<64x256xf32, #tpu.memory_space<vmem>>, vector<64x256xf32>
    %c0_18 = arith.constant 0 : index
    %c0_19 = arith.constant 0 : index
    %41 = vector.load %arg7[%c0_18, %c0_19] : memref<1x256xf32, #tpu.memory_space<vmem>>, vector<1x256xf32>
    %42 = vector.extract_strided_slice %33 {offsets = [0, 0], sizes = [16, 32], strides = [1, 1]} : vector<16x64xf32> to vector<16x32xf32>
    %43 = vector.shape_cast %42 : vector<16x32xf32> to vector<2x8x32xf32>
    %44 = vector.extract_strided_slice %34 {offsets = [0, 0], sizes = [16, 32], strides = [1, 1]} : vector<16x64xf32> to vector<16x32xf32>
    %45 = vector.shape_cast %44 : vector<16x32xf32> to vector<2x8x32xf32>
    %46 = vector.extract_strided_slice %35 {offsets = [0, 0], sizes = [16, 32], strides = [1, 1]} : vector<16x64xf32> to vector<16x32xf32>
    %47 = vector.shape_cast %46 : vector<16x32xf32> to vector<2x8x32xf32>
    "tpu.trace_start"() <{level = 10 : i32, message = "btd,bsd->bts"}> : () -> ()
    %cst_20 = arith.constant dense<0.000000e+00> : vector<2x8x8xf32>
    %48 = tpu.matmul %43, %45, %cst_20 {dimension_numbers = #tpu.dot_dimension_numbers<[2], [2], [1], [1], [0, 0, 0, 1, 1, 1], [0], [0]>} : vector<2x8x32xf32>, vector<2x8x32xf32>, vector<2x8x8xf32> -> vector<2x8x8xf32>
    %cst_21 = arith.constant 0xFF800000 : f32
    "tpu.trace_stop"() : () -> ()
    %49 = vector.shape_cast %39 : vector<1x8x8xi1> to vector<1x8x8xi1>
    %50 = vector.broadcast %49 : vector<1x8x8xi1> to vector<2x8x8xi1>
    %51 = vector.broadcast %cst_21 : f32 to vector<2x8x8xf32>
    %52 = arith.select %50, %48, %51 : vector<2x8x8xi1>, vector<2x8x8xf32>
    %cst_22 = arith.constant dense<0xFF800000> : vector<2x8xf32>
    %53 = vector.multi_reduction <maximumf>, %52, %cst_22 [2] : vector<2x8x8xf32> to vector<2x8xf32>
    %54 = vector.shape_cast %53 : vector<2x8xf32> to vector<2x8x1xf32>
    %55 = vector.broadcast %54 : vector<2x8x1xf32> to vector<2x8x8xf32>
    %56 = arith.subf %52, %55 : vector<2x8x8xf32>
    %57 = math.exp %56 : vector<2x8x8xf32>
    %cst_23 = arith.constant dense<0.000000e+00> : vector<2x8xf32>
    %58 = vector.multi_reduction <add>, %57, %cst_23 [2] : vector<2x8x8xf32> to vector<2x8xf32>
    %59 = vector.shape_cast %58 : vector<2x8xf32> to vector<2x8x1xf32>
    %60 = tpu.reciprocal %59 {approx = true} : vector<2x8x1xf32> -> vector<2x8x1xf32>
    %61 = vector.broadcast %60 : vector<2x8x1xf32> to vector<2x8x8xf32>
    %62 = arith.mulf %57, %61 : vector<2x8x8xf32>
    "tpu.trace_start"() <{level = 10 : i32, message = "bts,bsd->btd"}> : () -> ()
    %cst_24 = arith.constant dense<0.000000e+00> : vector<2x8x32xf32>
    %63 = tpu.matmul %62, %47, %cst_24 {dimension_numbers = #tpu.dot_dimension_numbers<[2], [1], [1], [2], [0, 0, 0, 1, 1, 2], [0], [0]>} : vector<2x8x8xf32>, vector<2x8x32xf32>, vector<2x8x32xf32> -> vector<2x8x32xf32>
    "tpu.trace_stop"() : () -> ()
    %64 = vector.shape_cast %63 : vector<2x8x32xf32> to vector<16x32xf32>
    %65 = vector.extract_strided_slice %40 {offsets = [0, 0], sizes = [32, 256], strides = [1, 1]} : vector<64x256xf32> to vector<32x256xf32>
    %cst_25 = arith.constant dense<0.000000e+00> : vector<16x256xf32>
    %66 = tpu.matmul %64, %65, %cst_25 {dimension_numbers = #tpu.dot_dimension_numbers<[1], [0], [0], [1], [0, 0, 1, 1], [], []>} : vector<16x32xf32>, vector<32x256xf32>, vector<16x256xf32> -> vector<16x256xf32>
    %67 = vector.broadcast %41 : vector<1x256xf32> to vector<16x256xf32>
    %68 = arith.addf %67, %66 : vector<16x256xf32>
    %69 = vector.extract_strided_slice %33 {offsets = [0, 32], sizes = [16, 32], strides = [1, 1]} : vector<16x64xf32> to vector<16x32xf32>
    %70 = vector.shape_cast %69 : vector<16x32xf32> to vector<2x8x32xf32>
    %71 = vector.extract_strided_slice %34 {offsets = [0, 32], sizes = [16, 32], strides = [1, 1]} : vector<16x64xf32> to vector<16x32xf32>
    %72 = vector.shape_cast %71 : vector<16x32xf32> to vector<2x8x32xf32>
    %73 = vector.extract_strided_slice %35 {offsets = [0, 32], sizes = [16, 32], strides = [1, 1]} : vector<16x64xf32> to vector<16x32xf32>
    %74 = vector.shape_cast %73 : vector<16x32xf32> to vector<2x8x32xf32>
    "tpu.trace_start"() <{level = 10 : i32, message = "btd,bsd->bts"}> : () -> ()
    %cst_26 = arith.constant dense<0.000000e+00> : vector<2x8x8xf32>
    %75 = tpu.matmul %70, %72, %cst_26 {dimension_numbers = #tpu.dot_dimension_numbers<[2], [2], [1], [1], [0, 0, 0, 1, 1, 1], [0], [0]>} : vector<2x8x32xf32>, vector<2x8x32xf32>, vector<2x8x8xf32> -> vector<2x8x8xf32>
    %cst_27 = arith.constant 0xFF800000 : f32
    "tpu.trace_stop"() : () -> ()
    %76 = vector.shape_cast %39 : vector<1x8x8xi1> to vector<1x8x8xi1>
    %77 = vector.broadcast %76 : vector<1x8x8xi1> to vector<2x8x8xi1>
    %78 = vector.broadcast %cst_27 : f32 to vector<2x8x8xf32>
    %79 = arith.select %77, %75, %78 : vector<2x8x8xi1>, vector<2x8x8xf32>
    %cst_28 = arith.constant dense<0xFF800000> : vector<2x8xf32>
    %80 = vector.multi_reduction <maximumf>, %79, %cst_28 [2] : vector<2x8x8xf32> to vector<2x8xf32>
    %81 = vector.shape_cast %80 : vector<2x8xf32> to vector<2x8x1xf32>
    %82 = vector.broadcast %81 : vector<2x8x1xf32> to vector<2x8x8xf32>
    %83 = arith.subf %79, %82 : vector<2x8x8xf32>
    %84 = math.exp %83 : vector<2x8x8xf32>
    %cst_29 = arith.constant dense<0.000000e+00> : vector<2x8xf32>
    %85 = vector.multi_reduction <add>, %84, %cst_29 [2] : vector<2x8x8xf32> to vector<2x8xf32>
    %86 = vector.shape_cast %85 : vector<2x8xf32> to vector<2x8x1xf32>
    %87 = tpu.reciprocal %86 {approx = true} : vector<2x8x1xf32> -> vector<2x8x1xf32>
    %88 = vector.broadcast %87 : vector<2x8x1xf32> to vector<2x8x8xf32>
    %89 = arith.mulf %84, %88 : vector<2x8x8xf32>
    "tpu.trace_start"() <{level = 10 : i32, message = "bts,bsd->btd"}> : () -> ()
    %cst_30 = arith.constant dense<0.000000e+00> : vector<2x8x32xf32>
    %90 = tpu.matmul %89, %74, %cst_30 {dimension_numbers = #tpu.dot_dimension_numbers<[2], [1], [1], [2], [0, 0, 0, 1, 1, 2], [0], [0]>} : vector<2x8x8xf32>, vector<2x8x32xf32>, vector<2x8x32xf32> -> vector<2x8x32xf32>
    "tpu.trace_stop"() : () -> ()
    %91 = vector.shape_cast %90 : vector<2x8x32xf32> to vector<16x32xf32>
    %92 = vector.extract_strided_slice %40 {offsets = [32, 0], sizes = [32, 256], strides = [1, 1]} : vector<64x256xf32> to vector<32x256xf32>
    %cst_31 = arith.constant dense<0.000000e+00> : vector<16x256xf32>
    %93 = tpu.matmul %91, %92, %cst_31 {dimension_numbers = #tpu.dot_dimension_numbers<[1], [0], [0], [1], [0, 0, 1, 1], [], []>} : vector<16x32xf32>, vector<32x256xf32>, vector<16x256xf32> -> vector<16x256xf32>
    %94 = arith.addf %68, %93 : vector<16x256xf32>
    %95 = arith.addf %1, %94 : vector<16x256xf32>
    %c0_32 = arith.constant 0 : index
    %c0_33 = arith.constant 0 : index
    %96 = vector.load %arg8[%c0_32, %c0_33] : memref<1x256xf32, #tpu.memory_space<vmem>>, vector<1x256xf32>
    %c0_34 = arith.constant 0 : index
    %c0_35 = arith.constant 0 : index
    %97 = vector.load %arg9[%c0_34, %c0_35] : memref<1x256xf32, #tpu.memory_space<vmem>>, vector<1x256xf32>
    %cst_36 = arith.constant dense<0.000000e+00> : vector<16xf32>
    %98 = vector.multi_reduction <add>, %95, %cst_36 [1] : vector<16x256xf32> to vector<16xf32>
    %99 = vector.shape_cast %98 : vector<16xf32> to vector<16x1xf32>
    %cst_37 = arith.constant 2.560000e+02 : f32
    %100 = vector.broadcast %cst_37 : f32 to vector<16x1xf32>
    %101 = arith.divf %99, %100 : vector<16x1xf32>
    %102 = vector.broadcast %101 : vector<16x1xf32> to vector<16x256xf32>
    %103 = arith.subf %95, %102 : vector<16x256xf32>
    %104 = arith.mulf %103, %103 : vector<16x256xf32>
    %cst_38 = arith.constant dense<0.000000e+00> : vector<16xf32>
    %105 = vector.multi_reduction <add>, %104, %cst_38 [1] : vector<16x256xf32> to vector<16xf32>
    %106 = vector.shape_cast %105 : vector<16xf32> to vector<16x1xf32>
    %cst_39 = arith.constant 2.560000e+02 : f32
    %107 = vector.broadcast %cst_39 : f32 to vector<16x1xf32>
    %108 = arith.divf %106, %107 : vector<16x1xf32>
    %109 = vector.broadcast %101 : vector<16x1xf32> to vector<16x256xf32>
    %110 = arith.subf %95, %109 : vector<16x256xf32>
    %cst_40 = arith.constant 9.99999974E-6 : f32
    %111 = vector.broadcast %cst_40 : f32 to vector<16x1xf32>
    %112 = arith.addf %108, %111 : vector<16x1xf32>
    %113 = math.rsqrt %112 : vector<16x1xf32>
    %114 = vector.broadcast %113 : vector<16x1xf32> to vector<16x256xf32>
    %115 = arith.mulf %110, %114 : vector<16x256xf32>
    %116 = vector.broadcast %96 : vector<1x256xf32> to vector<16x256xf32>
    %117 = arith.mulf %115, %116 : vector<16x256xf32>
    %118 = vector.broadcast %97 : vector<1x256xf32> to vector<16x256xf32>
    %119 = arith.addf %117, %118 : vector<16x256xf32>
    %c0_41 = arith.constant 0 : index
    %c0_42 = arith.constant 0 : index
    %120 = vector.load %arg10[%c0_41, %c0_42] : memref<256x1024xf32, #tpu.memory_space<vmem>>, vector<256x1024xf32>
    %cst_43 = arith.constant dense<0.000000e+00> : vector<16x1024xf32>
    %121 = tpu.matmul %119, %120, %cst_43 {dimension_numbers = #tpu.dot_dimension_numbers<[1], [0], [0], [1], [0, 0, 1, 1], [], []>} : vector<16x256xf32>, vector<256x1024xf32>, vector<16x1024xf32> -> vector<16x1024xf32>
    %c0_44 = arith.constant 0 : index
    %c0_45 = arith.constant 0 : index
    %122 = vector.load %arg11[%c0_44, %c0_45] : memref<1x1024xf32, #tpu.memory_space<vmem>>, vector<1x1024xf32>
    %123 = vector.broadcast %122 : vector<1x1024xf32> to vector<16x1024xf32>
    %124 = arith.addf %121, %123 : vector<16x1024xf32>
    %cst_46 = arith.constant 0.000000e+00 : f32
    %125 = vector.broadcast %cst_46 : f32 to vector<16x1024xf32>
    %126 = arith.maximumf %124, %125 : vector<16x1024xf32>
    %c0_47 = arith.constant 0 : index
    %c0_48 = arith.constant 0 : index
    %127 = vector.load %arg12[%c0_47, %c0_48] : memref<1024x256xf32, #tpu.memory_space<vmem>>, vector<1024x256xf32>
    %cst_49 = arith.constant dense<0.000000e+00> : vector<16x256xf32>
    %128 = tpu.matmul %126, %127, %cst_49 {dimension_numbers = #tpu.dot_dimension_numbers<[1], [0], [0], [1], [0, 0, 1, 1], [], []>} : vector<16x1024xf32>, vector<1024x256xf32>, vector<16x256xf32> -> vector<16x256xf32>
    %c0_50 = arith.constant 0 : index
    %c0_51 = arith.constant 0 : index
    %129 = vector.load %arg13[%c0_50, %c0_51] : memref<1x256xf32, #tpu.memory_space<vmem>>, vector<1x256xf32>
    %130 = vector.broadcast %129 : vector<1x256xf32> to vector<16x256xf32>
    %131 = arith.addf %128, %130 : vector<16x256xf32>
    %132 = arith.addf %95, %131 : vector<16x256xf32>
    %133 = vector.shape_cast %132 : vector<16x256xf32> to vector<2x8x256xf32>
    %c0_52 = arith.constant 0 : index
    %c0_53 = arith.constant 0 : index
    %c0_54 = arith.constant 0 : index
    %134 = vector.load %arg14[%c0_52, %c0_53, %c0_54] : memref<2x8x256xf32, #tpu.memory_space<vmem>>, vector<2x8x256xf32>
    tpu.vector_store %arg14[%c0_52, %c0_53, %c0_54], %133 {strides = array<i32>} : memref<2x8x256xf32, #tpu.memory_space<vmem>>, vector<2x8x256xf32>,
    return
  }
  func.func @transform_0(%arg0: i32) -> (i32, i32, i32) {
    %c0_i32 = arith.constant 0 : i32
    %c0_i32_0 = arith.constant 0 : i32
    %c0_i32_1 = arith.constant 0 : i32
    return %arg0, %c0_i32, %c0_i32_0 : i32, i32, i32
  }
  func.func @transform_1(%arg0: i32) -> (i32, i32) {
    %c0_i32 = arith.constant 0 : i32
    %c0_i32_0 = arith.constant 0 : i32
    %c0_i32_1 = arith.constant 0 : i32
    return %c0_i32, %c0_i32_0 : i32, i32
  }
  func.func @transform_2(%arg0: i32) -> (i32, i32) {
    %c0_i32 = arith.constant 0 : i32
    %c0_i32_0 = arith.constant 0 : i32
    %c0_i32_1 = arith.constant 0 : i32
    return %c0_i32, %c0_i32_0 : i32, i32
  }
  func.func @transform_3(%arg0: i32) -> (i32, i32) {
    %c0_i32 = arith.constant 0 : i32
    %c0_i32_0 = arith.constant 0 : i32
    %c0_i32_1 = arith.constant 0 : i32
    return %c0_i32, %c0_i32_0 : i32, i32
  }
  func.func @transform_4(%arg0: i32) -> (i32, i32) {
    %c0_i32 = arith.constant 0 : i32
    %c0_i32_0 = arith.constant 0 : i32
    %c0_i32_1 = arith.constant 0 : i32
    return %c0_i32, %c0_i32_0 : i32, i32
  }
  func.func @transform_5(%arg0: i32) -> (i32, i32) {
    %c0_i32 = arith.constant 0 : i32
    %c0_i32_0 = arith.constant 0 : i32
    %c0_i32_1 = arith.constant 0 : i32
    return %c0_i32, %c0_i32_0 : i32, i32
  }
  func.func @transform_6(%arg0: i32) -> (i32, i32) {
    %c0_i32 = arith.constant 0 : i32
    %c0_i32_0 = arith.constant 0 : i32
    %c0_i32_1 = arith.constant 0 : i32
    return %c0_i32, %c0_i32_0 : i32, i32
  }
  func.func @transform_7(%arg0: i32) -> (i32, i32) {
    %c0_i32 = arith.constant 0 : i32
    %c0_i32_0 = arith.constant 0 : i32
    %c0_i32_1 = arith.constant 0 : i32
    return %c0_i32, %c0_i32_0 : i32, i32
  }
  func.func @transform_8(%arg0: i32) -> (i32, i32) {
    %c0_i32 = arith.constant 0 : i32
    %c0_i32_0 = arith.constant 0 : i32
    %c0_i32_1 = arith.constant 0 : i32
    return %c0_i32, %c0_i32_0 : i32, i32
  }
  func.func @transform_9(%arg0: i32) -> (i32, i32) {
    %c0_i32 = arith.constant 0 : i32
    %c0_i32_0 = arith.constant 0 : i32
    %c0_i32_1 = arith.constant 0 : i32
    return %c0_i32, %c0_i32_0 : i32, i32
  }
  func.func @transform_10(%arg0: i32) -> (i32, i32) {
    %c0_i32 = arith.constant 0 : i32
    %c0_i32_0 = arith.constant 0 : i32
    %c0_i32_1 = arith.constant 0 : i32
    return %c0_i32, %c0_i32_0 : i32, i32
  }
  func.func @transform_11(%arg0: i32) -> (i32, i32) {
    %c0_i32 = arith.constant 0 : i32
    %c0_i32_0 = arith.constant 0 : i32
    %c0_i32_1 = arith.constant 0 : i32
    return %c0_i32, %c0_i32_0 : i32, i32
  }
  func.func @transform_12(%arg0: i32) -> (i32, i32) {
    %c0_i32 = arith.constant 0 : i32
    %c0_i32_0 = arith.constant 0 : i32
    %c0_i32_1 = arith.constant 0 : i32
    return %c0_i32, %c0_i32_0 : i32, i32
  }
  func.func @transform_13(%arg0: i32) -> (i32, i32, i32) {
    %c0_i32 = arith.constant 0 : i32
    %c0_i32_0 = arith.constant 0 : i32
    %c0_i32_1 = arith.constant 0 : i32
    return %arg0, %c0_i32, %c0_i32_0 : i32, i32, i32
  }
}

</mosaic_0001>

<bundles_post_ra>
// kernel: tpu_custom_call.1
= control target key start
LH: loop header
LB: loop body
LE: loop exit
PB: predicated region body
PF: predicated region fallthrough
CT: control target
= control target key end

     0   :  { %18 = vsyncpa [#allocation3], 0  ;;  %s2938_s0 = inlined_call_operand.vmem [shape: f32[2,8,256], index: 0, kind: input, shape index: {}]   ;;  %s2939_s1 = inlined_call_operand.vmem [shape: f32[1,256], index: 1, kind: input, shape index: {}]   ;;  %s2940_s2 = inlined_call_operand.vmem [shape: f32[1,256], index: 2, kind: input, shape index: {}]   ;;  %s2941_s3 = inlined_call_operand.vmem [shape: f32[256,192], index: 3, kind: input, shape index: {}]   ;;  %s2942_s4 = inlined_call_operand.vmem [shape: f32[1,192], index: 4, kind: input, shape index: {}]   ;;  %s2943_s5 = inlined_call_operand.vmem [shape: f32[64,256], index: 5, kind: input, shape index: {}]   ;;  %s2944_s6 = inlined_call_operand.vmem [shape: f32[1,256], index: 6, kind: input, shape index: {}]   ;;  %s2945_s7 = inlined_call_operand.vmem [shape: f32[1,256], index: 7, kind: input, shape index: {}]   ;;  %s2946_s8 = inlined_call_operand.vmem [shape: f32[1,256], index: 8, kind: input, shape index: {}]   ;;  %s2947_s9 = inlined_call_operand.hbm [shape: f32[256,1024], index: 9, kind: input, shape index: {}]   ;;  %s2948_s10 = inlined_call_operand.vmem [shape: f32[1,1024], index: 10, kind: input, shape index: {}]   ;;  %s2949_s11 = inlined_call_operand.hbm [shape: f32[1024,256], index: 11, kind: input, shape index: {}]   ;;  %s2950_s12 = inlined_call_operand.vmem [shape: f32[1,256], index: 12, kind: input, shape index: {}]   ;;  %s2951_s13 = inlined_call_operand.hbm [shape: f32[2,8,256], index: 13, kind: output, shape index: {}]  }
   0x1   :  { %19 = vsyncpa [#allocation6], 0 }
   0x2   :  { %20 = vsyncpa [#allocation4], 0  ;;  %s43_s27 = sshll.u32 %s2947_s9, 4  ;;  %s2249_s28 = smov [#allocation2]   ;;  %s44_s27 = int_to_ptr.hbm [resolvable:$true] %s43_s27 }
   0x3   :  { %s45_s29 = sshll.u32 %s2249_s28, 4  ;;  %s58_s15 = sshll.u32 %s2949_s11, 4  ;;  %s46_s29 = int_to_ptr.vmem [resolvable:$true] %s45_s29  ;;  %s59_s15 = int_to_ptr.hbm [resolvable:$true] %s58_s15 }
   0x4   :  { %s2250_s16 = smov 1024   ;;  %s2251_s17 = smov 64  }
   0x5   :  { %51 = dma.hbm_to_vmem [thread:$0]  %s44_s27, 32768, %s46_s29, [#allocation3], %s2250_s16, %s2250_s16, %s2251_s17  }
   0x6   :  { %s2252_s18 = smov [#allocation5]   ;;  %s2253_s20 = smov 256  }
   0x7   :  { %s60_s19 = sshll.u32 %s2252_s18, 4  ;;  %s2254_s21 = smov 16   ;;  %s61_s19 = int_to_ptr.vmem [resolvable:$true] %s60_s19 }
   0x8   :  { %66 = dma.hbm_to_vmem [thread:$0]  %s59_s15, 32768, %s61_s19, [#allocation6], %s2253_s20, %s2253_s20, %s2254_s21  }
   0x9   :  { %2243 = dma.done.wait [#allocation3], 32768  }
   0xa   :  { %2244 = vsyncadd [#allocation3], 4294934528 }
   0xb   :  { %2245 = dma.done.wait [#allocation6], 32768  }
   0xc   :  { %2246 = vsyncadd [#allocation6], 4294934528  ;;  %v2342_v0 = vld [vmem:[%s2938_s0] sm:$0xff]  ;;  %v2347_v1 = vld [vmem:[%s2938_s0 + $0x8] sm:$0xff]  ;;  %v2255_v6 = vmov 256.0   ;;  %vm347_vm7 = vcmask 261120  }
   0xd   :  { %v83_v2 = vadd.f32 %v2347_v1, %v2342_v0  ;;  %v2354_v3 = vld [vmem:[%s2938_s0 + $0x10] sm:$0xff]  ;;  %v2359_v4 = vld [vmem:[%s2938_s0 + $0x18] sm:$0xff]  ;;  %2145 = vrcp.f32 %v2255_v6  ;;  %v186_v14 = vld [vmem:[%s2941_s3 + $0xe0] sm:$0xff]  ;;  %vm405_vm9 = vcmask 64512  }
   0xe   :  { %v86_v5 = vadd.f32 %v2359_v4, %v2354_v3  ;;  %v188_v9 = vld [vmem:[%s2941_s3 + $0xf0] sm:$0xff]  ;;  %v189_v11 = vld [vmem:[%s2941_s3 + $0xf8] sm:$0xff]  ;;  %v218_v15 = vld [vmem:[%s2941_s3 + $0x1e0] sm:$0xff] }
   0xf   :  { %84 = vadd.xlane.f32.xlu0 %v83_v2  ;;  %v220_v10 = vld [vmem:[%s2941_s3 + $0x1f0] sm:$0xff]  ;;  %228 = vmatpush.msra.mxu0 %v188_v9  ;;  %v221_v13 = vld [vmem:[%s2941_s3 + $0x1f8] sm:$0xff]  ;;  %v187_v16 = vld [vmem:[%s2941_s3 + $0xe8] sm:$0xff] }
  0x10   :  { %251 = vmatpush.msra.mxu1 %v220_v10  ;;  %274 = vmatpush.msra.mxu2 %v189_v11  ;;  %v219_v17 = vld [vmem:[%s2941_s3 + $0x1e8] sm:$0xff]  ;;  %v184_v35 = vld [vmem:[%s2941_s3 + $0xd0] sm:$0xff]  ;;  %v185_v37 = vld [vmem:[%s2941_s3 + $0xd8] sm:$0xff] }
  0x11   :  { %297 = vmatpush.msra.mxu3 %v221_v13  ;;  %229 = vmatpush.msra.mxu0 %v186_v14  ;;  %v216_v36 = vld [vmem:[%s2941_s3 + $0x1d0] sm:$0xff]  ;;  %v217_v38 = vld [vmem:[%s2941_s3 + $0x1d8] sm:$0xff]  ;;  %v182_v39 = vld [vmem:[%s2941_s3 + $0xc0] sm:$0xff] }
  0x12   :  { %252 = vmatpush.msra.mxu1 %v218_v15  ;;  %275 = vmatpush.msra.mxu2 %v187_v16  ;;  %v214_v40 = vld [vmem:[%s2941_s3 + $0x1c0] sm:$0xff]  ;;  %v183_v41 = vld [vmem:[%s2941_s3 + $0xc8] sm:$0xff]  ;;  %v180_v43 = vld [vmem:[%s2941_s3 + $0xb0] sm:$0xff] }
  0x13   :  { %v2146_v7 = vpop.eup %2145  ;;  %298 = vmatpush.msra.mxu3 %v219_v17  ;;  %230 = vmatpush.msra.mxu0 %v184_v35  ;;  %v215_v42 = vld [vmem:[%s2941_s3 + $0x1c8] sm:$0xff]  ;;  %v212_v44 = vld [vmem:[%s2941_s3 + $0x1b0] sm:$0xff]  ;;  %v181_v45 = vld [vmem:[%s2941_s3 + $0xb8] sm:$0xff] }
  0x14   :  { %v90_v8 = vmul.f32 256.0, %v2146_v7  ;;  %vm94_vm0 = vweird.f32 %v2146_v7  ;;  %253 = vmatpush.msra.mxu1 %v216_v36  ;;  %276 = vmatpush.msra.mxu2 %v185_v37  ;;  %v213_v46 = vld [vmem:[%s2941_s3 + $0x1b8] sm:$0xff]  ;;  %v178_v47 = vld [vmem:[%s2941_s3 + $0xa0] sm:$0xff]  ;;  %v179_v49 = vld [vmem:[%s2941_s3 + $0xa8] sm:$0xff] }
  0x15   :  { %299 = vmatpush.msra.mxu3 %v217_v38  ;;  %231 = vmatpush.msra.mxu0 %v182_v39  ;;  %v210_v48 = vld [vmem:[%s2941_s3 + $0x1a0] sm:$0xff]  ;;  %v211_v50 = vld [vmem:[%s2941_s3 + $0x1a8] sm:$0xff]  ;;  %v176_v51 = vld [vmem:[%s2941_s3 + $0x90] sm:$0xff] }
  0x16   :  { %v91_v12 = vsub.f32 1.0, %v90_v8  ;;  %254 = vmatpush.msra.mxu1 %v214_v40  ;;  %277 = vmatpush.msra.mxu2 %v183_v41  ;;  %v208_v52 = vld [vmem:[%s2941_s3 + $0x190] sm:$0xff]  ;;  %v177_v53 = vld [vmem:[%s2941_s3 + $0x98] sm:$0xff]  ;;  %v174_v55 = vld [vmem:[%s2941_s3 + $0x80] sm:$0xff] }
  0x17   :  { %87 = vadd.xlane.f32.xlu0 %v86_v5  ;;  %300 = vmatpush.msra.mxu3 %v215_v42  ;;  %v209_v54 = vld [vmem:[%s2941_s3 + $0x198] sm:$0xff]  ;;  %v206_v56 = vld [vmem:[%s2941_s3 + $0x180] sm:$0xff]  ;;  %v175_v57 = vld [vmem:[%s2941_s3 + $0x88] sm:$0xff] }
  0x18   :  { %v92_v18 = vmul.f32 %v2146_v7, %v91_v12  ;;  %232 = vmatpush.msra.mxu0 %v180_v43  ;;  %255 = vmatpush.msra.mxu1 %v212_v44  ;;  %v207_v58 = vld [vmem:[%s2941_s3 + $0x188] sm:$0xff]  ;;  %v172_v59 = vld [vmem:[%s2941_s3 + $0x70] sm:$0xff]  ;;  %v173_v61 = vld [vmem:[%s2941_s3 + $0x78] sm:$0xff] }
  0x19   :  { %278 = vmatpush.msra.mxu2 %v181_v45  ;;  %301 = vmatpush.msra.mxu3 %v213_v46  ;;  %v204_v60 = vld [vmem:[%s2941_s3 + $0x170] sm:$0xff]  ;;  %v205_v62 = vld [vmem:[%s2941_s3 + $0x178] sm:$0xff]  ;;  %v170_v63 = vld [vmem:[%s2941_s3 + $0x60] sm:$0xff] }
  0x1a   :  { %v93_v19 = vadd.f32 %v2146_v7, %v92_v18  ;;  %233 = vmatpush.msra.mxu0 %v178_v47  ;;  %256 = vmatpush.msra.mxu1 %v210_v48  ;;  %v202_v2 = vld [vmem:[%s2941_s3 + $0x160] sm:$0xff]  ;;  %v171_v5 = vld [vmem:[%s2941_s3 + $0x68] sm:$0xff]  ;;  %v200_v8 = vld [vmem:[%s2941_s3 + $0x150] sm:$0xff] }
  0x1b   :  { %279 = vmatpush.msra.mxu2 %v179_v49  ;;  %302 = vmatpush.msra.mxu3 %v211_v50  ;;  %v203_v6 = vld [vmem:[%s2941_s3 + $0x168] sm:$0xff]  ;;  %v169_v9 = vld [vmem:[%s2941_s3 + $0x58] sm:$0xff]  ;;  %v166_v11 = vld [vmem:[%s2941_s3 + $0x40] sm:$0xff] }
  0x1c   :  { %v2387_v20 = vsel %vm94_vm0, %v2146_v7, %v93_v19  ;;  %234 = vmatpush.msra.mxu0 %v176_v51  ;;  %257 = vmatpush.msra.mxu1 %v208_v52  ;;  %v168_v7 = vld [vmem:[%s2941_s3 + $0x50] sm:$0xff]  ;;  %v201_v10 = vld [vmem:[%s2941_s3 + $0x158] sm:$0xff]  ;;  %v198_v12 = vld [vmem:[%s2941_s3 + $0x140] sm:$0xff] }
  0x1d   :  { %280 = vmatpush.msra.mxu2 %v177_v53  ;;  %303 = vmatpush.msra.mxu3 %v209_v54  ;;  %v167_v13 = vld [vmem:[%s2941_s3 + $0x48] sm:$0xff]  ;;  %v164_v15 = vld [vmem:[%s2941_s3 + $0x30] sm:$0xff]  ;;  %v165_v17 = vld [vmem:[%s2941_s3 + $0x38] sm:$0xff] }
  0x1e   :  { %235 = vmatpush.msra.mxu0 %v174_v55  ;;  %258 = vmatpush.msra.mxu1 %v206_v56  ;;  %v199_v14 = vld [vmem:[%s2941_s3 + $0x148] sm:$0xff]  ;;  %v196_v16 = vld [vmem:[%s2941_s3 + $0x130] sm:$0xff]  ;;  %v197_v18 = vld [vmem:[%s2941_s3 + $0x138] sm:$0xff] }
  0x1f   :  { %281 = vmatpush.msra.mxu2 %v175_v57  ;;  %304 = vmatpush.msra.mxu3 %v207_v58  ;;  %v162_v19 = vld [vmem:[%s2941_s3 + $0x20] sm:$0xff]  ;;  %v191_v35 = vld [vmem:[%s2941_s3 + $0x108] sm:$0xff] }
  0x20   :  { %236 = vmatpush.msra.mxu0 %v172_v59  ;;  %259 = vmatpush.msra.mxu1 %v204_v60  ;;  %v81_v47 = vld [vmem:[%s2939_s1] sm:$0x3]  ;;  %s2101_s1 = sshll.u32 %s2951_s13, 4  ;;  %s2102_s1 = int_to_ptr.hbm [resolvable:$true] %s2101_s1 }
  0x21   :  { %282 = vmatpush.msra.mxu2 %v173_v61  ;;  %305 = vmatpush.msra.mxu3 %v205_v62  ;;  %v82_v51 = vld [vmem:[%s2940_s2] sm:$0x3]  ;;  %v141_v52 = vperm.slane %v81_v47, 0  ;;  %v142_v53 = vperm.slane %v81_v47, 1 }
  0x22   :  { %237 = vmatpush.msra.mxu0 %v170_v63  ;;  %260 = vmatpush.msra.mxu1 %v202_v2  ;;  %v150_v57 = vperm.slane %v82_v51, 0  ;;  %v151_v59 = vperm.slane %v82_v51, 1 }
  0x23   :  { %283 = vmatpush.msra.mxu2 %v171_v5  ;;  %306 = vmatpush.msra.mxu3 %v203_v6 }
  0x24   :  { %238 = vmatpush.msra.mxu0 %v168_v7  ;;  %261 = vmatpush.msra.mxu1 %v200_v8 }
  0x25   :  { %284 = vmatpush.msra.mxu2 %v169_v9  ;;  %307 = vmatpush.msra.mxu3 %v201_v10 }
  0x26   :  { %239 = vmatpush.msra.mxu0 %v166_v11  ;;  %262 = vmatpush.msra.mxu1 %v198_v12  ;;  %v222_v12 = vld [vmem:[%s2942_s4] sm:$0x3]  ;;  %s2256_s4 = smov 96  }
  0x27   :  { %285 = vmatpush.msra.mxu2 %v167_v13  ;;  %308 = vmatpush.msra.mxu3 %v199_v14  ;;  %v224_v13 = vperm.slane %v222_v12, 0 }
  0x28   :  { %240 = vmatpush.msra.mxu0 %v164_v15  ;;  %263 = vmatpush.msra.mxu1 %v196_v16 }
  0x29   :  { %286 = vmatpush.msra.mxu2 %v165_v17  ;;  %309 = vmatpush.msra.mxu3 %v197_v18 }
  0x2a   :  { %241 = vmatpush.msra.mxu0 %v162_v19 }
  0x82   :  { %v85_v21 = vpop.xlane.xlu0 %84 }
  0x83   :  { %v96_v22 = vmul.f32 %v2387_v20, %v85_v21  ;;  %v194_v21 = vld [vmem:[%s2941_s3 + $0x120] sm:$0xff] }
  0x84   :  { %264 = vmatpush.msra.mxu1 %v194_v21 }
  0x85   :  { %v2391_v23 = vsub.f32 %v2342_v0, %v96_v22  ;;  %v2394_v24 = vsub.f32 %v2347_v1, %v96_v22  ;;  %v163_v22 = vld [vmem:[%s2941_s3 + $0x28] sm:$0xff] }
  0x86   :  { %287 = vmatpush.msra.mxu2 %v163_v22 }
  0x87   :  { %v102_v25 = vmul.f32 %v2391_v23, %v2391_v23  ;;  %v103_v26 = vmul.f32 %v2394_v24, %v2394_v24 }
  0x89   :  { %v106_v27 = vadd.f32 %v103_v26, %v102_v25  ;;  %v195_v25 = vld [vmem:[%s2941_s3 + $0x128] sm:$0xff]  ;;  %v160_v26 = vld [vmem:[%s2941_s3 + $0x10] sm:$0xff] }
  0x8a   :  { %v88_v28 = vpop.xlane.xlu0 %87  ;;  %310 = vmatpush.msra.mxu3 %v195_v25  ;;  %242 = vmatpush.msra.mxu0 %v160_v26 }
  0x8b   :  { %v97_v29 = vmul.f32 %v2387_v20, %v88_v28  ;;  %107 = vadd.xlane.f32.xlu1 %v106_v27  ;;  %v192_v27 = vld [vmem:[%s2941_s3 + $0x110] sm:$0xff]  ;;  %v161_v28 = vld [vmem:[%s2941_s3 + $0x18] sm:$0xff] }
  0x8c   :  { %265 = vmatpush.msra.mxu1 %v192_v27  ;;  %288 = vmatpush.msra.mxu2 %v161_v28 }
  0x8d   :  { %v2402_v30 = vsub.f32 %v2354_v3, %v97_v29  ;;  %v2405_v31 = vsub.f32 %v2359_v4, %v97_v29  ;;  %v193_v29 = vld [vmem:[%s2941_s3 + $0x118] sm:$0xff] }
  0x8e   :  { %311 = vmatpush.msra.mxu3 %v193_v29 }
  0x8f   :  { %v104_v32 = vmul.f32 %v2402_v30, %v2402_v30  ;;  %v105_v33 = vmul.f32 %v2405_v31, %v2405_v31 }
  0x90   :  { %312 = vmatpush.msra.mxu3 %v191_v35 }
  0x91   :  { %v109_v34 = vadd.f32 %v105_v33, %v104_v32  ;;  %v158_v32 = vld [vmem:[%s2941_s3] sm:$0xff] }
  0x92   :  { %v190_v33 = vld [vmem:[%s2941_s3 + $0x100] sm:$0xff]  ;;  %243 = vmatpush.msra.mxu0 %v158_v32 }
  0x93   :  { %110 = vadd.xlane.f32.xlu1 %v109_v34  ;;  %v159_v34 = vld [vmem:[%s2941_s3 + $0x8] sm:$0xff]  ;;  %266 = vmatpush.msra.mxu1 %v190_v33 }
  0x94   :  { %289 = vmatpush.msra.mxu2 %v159_v34 }
  0xfe   :  { %v108_v36 = vpop.xlane.xlu1 %107 }
  0xff   :  { %v112_v37 = vmul.f32 %v108_v36, %v2387_v20 }
 0x101   :  { %v114_v38 = vadd.f32 1e-05, %v112_v37 }
 0x103   :  { %2147 = vrsqrt.f32 %v114_v38  ;;  %vm122_vm2 = vweird.f32 %v114_v38 }
 0x106   :  { %v111_v39 = vpop.xlane.xlu1 %110 }
 0x107   :  { %v113_v40 = vmul.f32 %v111_v39, %v2387_v20 }
 0x109   :  { %v2148_v41 = vpop.eup %2147  ;;  %v115_v42 = vadd.f32 1e-05, %v113_v40 }
 0x10a   :  { %v117_v43 = vmul.f32 %v2148_v41, %v114_v38  ;;  %vm123_vm1 = vweird.f32 %v2148_v41  ;;  %v322_v38 = vlaneseq }
 0x10b   :  { %2149 = vrsqrt.f32 %v115_v42  ;;  %vm124_vm3 = vmor %vm122_vm2, %vm123_vm1  ;;  %vm132_vm4 = vweird.f32 %v115_v42 }
 0x10c   :  { %v118_v44 = vmul.f32 %v2148_v41, %v117_v43  ;;  %v2606_v39 = vshrl.u32 %v322_v38, 7  ;;  %v2608_v40 = vand.u32 127, %v322_v38  ;;  %v339_v38 = vld [vmem:[%s2943_s5 + $0x60] sm:$0xff] }
 0x10e   :  { %v119_v45 = vmul.f32 0.5, %v118_v44  ;;  %vm326_vm8 = vcmp.ge.s32.totalorder %v2606_v39, %v2608_v40  ;;  %v340_v39 = vld [vmem:[%s2943_s5 + $0x68] sm:$0xff]  ;;  %v338_v40 = vld [vmem:[%s2943_s5 + $0x58] sm:$0xff] }
 0x110   :  { %v120_v46 = vsub.f32 1.5, %v119_v45 }
 0x111   :  { %v2150_v48 = vpop.eup %2149 }
 0x112   :  { %v121_v49 = vmul.f32 %v2148_v41, %v120_v46  ;;  %v127_v50 = vmul.f32 %v2150_v48, %v115_v42  ;;  %vm133_vm5 = vweird.f32 %v2150_v48 }
 0x113   :  { %vm134_vm6 = vmor %vm132_vm4, %vm133_vm5 }
 0x114   :  { %v128_v54 = vmul.f32 %v2150_v48, %v127_v50  ;;  %v125_v55 = vsel %vm124_vm3, %v2148_v41, %v121_v49 }
 0x115   :  { %v136_v56 = vmul.f32 %v125_v55, %v2391_v23  ;;  %v137_v58 = vmul.f32 %v125_v55, %v2394_v24 }
 0x116   :  { %v129_v60 = vmul.f32 0.5, %v128_v54 }
 0x117   :  { %v145_v61 = vmul.f32 %v141_v52, %v136_v56  ;;  %v146_v62 = vmul.f32 %v142_v53, %v137_v58 }
 0x118   :  { %v130_v63 = vsub.f32 1.5, %v129_v60  ;;  %v334_v60 = vld [vmem:[%s2943_s5 + $0x38] sm:$0xff] }
 0x119   :  { %v154_v2 = vadd.f32 %v150_v57, %v145_v61  ;;  %v155_v5 = vadd.f32 %v151_v59, %v146_v62  ;;  %v331_v61 = vld [vmem:[%s2943_s5 + $0x20] sm:$0xff]  ;;  %v332_v62 = vld [vmem:[%s2943_s5 + $0x28] sm:$0xff] }
 0x11a   :  { %v131_v6 = vmul.f32 %v2150_v48, %v130_v63  ;;  %v329_v63 = vld [vmem:[%s2943_s5 + $0x10] sm:$0xff] }
 0x11b   :  { %244 = vmatmul.f32.vlgmr.msra.gmra.mxu0 %v154_v2  ;;  %267 = vmatmul.f32.vlgmr.msra.gmra.mxu1 %v155_v5 }
 0x11c   :  { %290 = vmatmul.f32.vlgmr.msra.gmra.mxu2 %v154_v2  ;;  %313 = vmatmul.f32.vlgmr.msra.gmra.mxu3 %v155_v5  ;;  %v135_v7 = vsel %vm134_vm6, %v2150_v48, %v131_v6  ;;  %v330_v2 = vld [vmem:[%s2943_s5 + $0x18] sm:$0xff] }
 0x11d   :  { %v138_v23 = vmul.f32 %v135_v7, %v2402_v30  ;;  %v139_v24 = vmul.f32 %v135_v7, %v2405_v31  ;;  %v225_v30 = vperm.slane %v222_v12, 1  ;;  %v328_v12 = vld [vmem:[%s2943_s5 + $0x8] sm:$0xff] }
 0x11f   :  { %v147_v8 = vmul.f32 %v141_v52, %v138_v23  ;;  %v148_v9 = vmul.f32 %v142_v53, %v139_v24 }
 0x121   :  { %v156_v10 = vadd.f32 %v150_v57, %v147_v8  ;;  %v157_v11 = vadd.f32 %v151_v59, %v148_v9  ;;  %v333_v59 = vld [vmem:[%s2943_s5 + $0x30] sm:$0xff] }
 0x123   :  { %247 = vmatmul.f32.gmra.mxu0 %v156_v10  ;;  %270 = vmatmul.f32.gmra.mxu1 %v157_v11 }
 0x124   :  { %293 = vmatmul.f32.gmra.mxu2 %v156_v10  ;;  %316 = vmatmul.f32.gmra.mxu3 %v157_v11  ;;  %v327_v11 = vld [vmem:[%s2943_s5] sm:$0xff] }
 0x198   :  { %v245_v14 = vpop.f32.mrf.mxu0  ;;  %v268_v15 = vpop.f32.mrf.mxu1 }
 0x199   :  { %v246_v16 = vadd.f32 %v245_v14, %v224_v13 }
 0x19b   :  { %v269_v17 = vadd.f32 %v268_v15, %v246_v16 }
 0x19d   :  { %345 = vrot.lane.b32.xlu2 %v269_v17, %s2251_s17  ;;  %v320_v35 = vmul.f32 0.17677669, %v269_v17 }
 0x19f   :  { %v291_v31 = vpop.f32.mrf.mxu2  ;;  %v314_v18 = vpop.f32.mrf.mxu3 }
 0x1a0   :  { %v292_v19 = vadd.f32 %v291_v31, %v225_v30  ;;  %v248_v21 = vpop.f32.mrf.mxu0  ;;  %v271_v26 = vpop.f32.mrf.mxu1 }
 0x1a1   :  { %v249_v22 = vadd.f32 %v248_v21, %v224_v13 }
 0x1a2   :  { %v2595_v25 = vadd.f32 %v314_v18, %v292_v19 }
 0x1a3   :  { %v272_v27 = vadd.f32 %v271_v26, %v249_v22 }
 0x1a4   :  { %446 = vmatpush.msrb.mxu2 %v2595_v25 }
 0x1a5   :  { %374 = vrot.lane.b32.xlu2 %v272_v27, %s2251_s17  ;;  %v321_v37 = vmul.f32 0.17677669, %v272_v27  ;;  %s2257_s17 = smov 32  }
 0x1a7   :  { %v294_v28 = vpop.f32.mrf.mxu2  ;;  %v317_v32 = vpop.f32.mrf.mxu3 }
 0x1a8   :  { %v295_v29 = vadd.f32 %v294_v28, %v225_v30 }
 0x1aa   :  { %v2599_v33 = vadd.f32 %v317_v32, %v295_v29 }
 0x1ac   :  { %469 = vmatpush.msrb.mxu3 %v2599_v33 }
 0x1f7   :  { %v346_v34 = vpop.permute.xlu2 %345 }
 0x1f8   :  { %2115 = vmatpush.xpose.msk.msrb.mxu0 %vm347_vm7, %v346_v34 }
 0x1fb   :  { %2116 = vmatmul.msk.f32.vlgmr.msrb.gmra.mxu0 %vm347_vm7, %v320_v35 }
 0x1fc   :  { %492 = vmatpush.msra.mxu0 %v333_v59 }
 0x1fe   :  { %493 = vmatpush.msra.mxu0 %v331_v61 }
 0x1ff   :  { %v375_v36 = vpop.permute.xlu2 %374 }
 0x200   :  { %2117 = vmatpush.xpose.msk.msrb.mxu1 %vm347_vm7, %v375_v36  ;;  %494 = vmatpush.msra.mxu0 %v329_v63 }
 0x202   :  { %495 = vmatpush.msra.mxu0 %v327_v11 }
 0x203   :  { %2118 = vmatmul.msk.f32.vlgmr.msrb.gmra.mxu1 %vm347_vm7, %v321_v37 }
 0x204   :  { %515 = vmatpush.msra.mxu1 %v334_v60 }
 0x206   :  { %516 = vmatpush.msra.mxu1 %v332_v62 }
 0x208   :  { %517 = vmatpush.msra.mxu1 %v330_v2 }
 0x20a   :  { %518 = vmatpush.msra.mxu1 %v328_v12 }
 0x278   :  { %v370_v41 = vpop.f32.mrf.mxu0 }
 0x279   :  { %v403_v42 = vsel %vm326_vm8, %v370_v41, -inf }
 0x27a   :  { %v406_v43 = vsel %vm405_vm9, %v403_v42, -inf }
 0x27b   :  { %407 = vmax.xlane.f32.xlu0 %v406_v43 }
 0x280   :  { %v398_v44 = vpop.f32.mrf.mxu1 }
 0x281   :  { %v404_v45 = vsel %vm326_vm8, %v398_v44, -inf }
 0x282   :  { %v409_v46 = vsel %vm405_vm9, %v404_v45, -inf }
 0x283   :  { %410 = vmax.xlane.f32.xlu1 %v409_v46 }
 0x28f   :  { %535 = vrot.lane.b32.xlu0 %v320_v35, %s2256_s4 }
 0x29c   :  { %537 = vrot.lane.b32.xlu1 %v269_v17, %s2257_s17 }
 0x2a4   :  { %565 = vrot.lane.b32.xlu1 %v272_v27, %s2257_s17 }
 0x2ee   :  { %v408_v47 = vpop.xlane.xlu0 %407 }
 0x2ef   :  { %v412_v48 = vsub.f32 %v403_v42, %v408_v47 }
 0x2f1   :  { %v414_v49 = vmul.f32 1.442695, %v412_v48  ;;  %v335_v48 = vld [vmem:[%s2943_s5 + $0x40] sm:$0xff] }
 0x2f3   :  { %2151 = vpow2.f32 %v414_v49  ;;  %v336_v49 = vld [vmem:[%s2943_s5 + $0x48] sm:$0xff] }
 0x2f6   :  { %v411_v50 = vpop.xlane.xlu1 %410 }
 0x2f7   :  { %v413_v51 = vsub.f32 %v404_v45, %v411_v50 }
 0x2f9   :  { %v2152_v52 = vpop.eup %2151  ;;  %v416_v53 = vmul.f32 1.442695, %v413_v51 }
 0x2fa   :  { %v418_v54 = vsel %vm405_vm9, %v2152_v52, 0.0 }
 0x2fb   :  { %2153 = vpow2.f32 %v416_v53  ;;  %419 = vadd.xlane.f32.xlu2 %v418_v54  ;;  %v343_v54 = vld [vmem:[%s2944_s6] sm:$0x3] }
 0x301   :  { %v2154_v55 = vpop.eup %2153  ;;  %v536_v5 = vpop.permute.xlu0 %535 }
 0x302   :  { %v421_v56 = vsel %vm405_vm9, %v2154_v55, 0.0 }
 0x303   :  { %422 = vadd.xlane.f32.xlu0 %v421_v56 }
 0x30e   :  { %v538_v57 = vpop.permute.xlu1 %537 }
 0x30f   :  { %2125 = vmatpush.xpose.msk.msra.mxu2 %vm347_vm7, %v538_v57  ;;  %v527_v57 = vperm.slane %v343_v54, 0 }
 0x316   :  { %v566_v58 = vpop.permute.xlu1 %565 }
 0x317   :  { %563 = vrot.lane.b32.xlu0 %v321_v37, %s2256_s4  ;;  %2127 = vmatpush.xpose.msk.msra.mxu3 %vm347_vm7, %v566_v58  ;;  %v342_v37 = vld [vmem:[%s2943_s5 + $0x78] sm:$0xff]  ;;  %v528_v58 = vperm.slane %v343_v54, 1 }
 0x318   :  { %710 = vmatpush.msrb.mxu1 %v342_v37  ;;  %v880_v37 = vld [vmem:[#allocation2 + $0x288] sm:$0xff] }
 0x31a   :  { %711 = vmatpush.msrb.mxu1 %v340_v39  ;;  %v871_v39 = vld [vmem:[#allocation2 + $0x240] sm:$0xff] }
 0x31c   :  { %712 = vmatpush.msrb.mxu1 %v338_v40  ;;  %v872_v40 = vld [vmem:[#allocation2 + $0x248] sm:$0xff] }
 0x31e   :  { %713 = vmatpush.msrb.mxu1 %v336_v49 }
 0x36e   :  { %v420_v6 = vpop.xlane.xlu2 %419 }
 0x36f   :  { %2155 = vrcp.f32 %v420_v6 }
 0x375   :  { %v2156_v7 = vpop.eup %2155 }
 0x376   :  { %v423_v23 = vpop.xlane.xlu0 %422  ;;  %v426_v24 = vmul.f32 %v2156_v7, %v2152_v52 }
 0x377   :  { %2157 = vrcp.f32 %v423_v23 }
 0x378   :  { %2119 = vmatmul.msk.f32.vlgmr.msrb.gmra.mxu2 %vm405_vm9, %v426_v24 }
 0x37d   :  { %v2158_v8 = vpop.eup %2157 }
 0x37e   :  { %v427_v9 = vmul.f32 %v2158_v8, %v2154_v55 }
 0x380   :  { %2120 = vmatmul.msk.f32.vlgmr.msrb.gmra.mxu3 %vm405_vm9, %v427_v9  ;;  %2126 = vmatmul.msk.f32.vlgmr.msra.gmra.mxu2 %vm347_vm7, %v536_v5 }
 0x389   :  { %v564_v10 = vpop.permute.xlu0 %563 }
 0x38a   :  { %2128 = vmatmul.msk.f32.vlgmr.msra.gmra.mxu3 %vm347_vm7, %v564_v10 }
 0x3fb   :  { %v448_v13 = vpop.f32.mrf.mxu2 }
 0x3fc   :  { %2121 = vmatmul.msk.f32.vlgmr.msra.gmra.mxu0 %vm347_vm7, %v448_v13  ;;  %2123 = vmatmul.msk.f32.vlgmr.msra.gmra.mxu1 %vm347_vm7, %v448_v13 }
 0x403   :  { %v471_v14 = vpop.f32.mrf.mxu3  ;;  %v560_v15 = vpop.f32.mrf.mxu2 }
 0x404   :  { %v591_v16 = vsel %vm326_vm8, %v560_v15, -inf  ;;  %2122 = vmatmul.msk.f32.gmra.mxu0 %vm347_vm7, %v471_v14  ;;  %2124 = vmatmul.msk.f32.gmra.mxu1 %vm347_vm7, %v471_v14  ;;  %v1047_v14 = vld [vmem:[#allocation2 + $0x7c0] sm:$0xff]  ;;  %v920_v15 = vld [vmem:[#allocation2 + $0x3c8] sm:$0xff] }
 0x405   :  { %v593_v17 = vsel %vm405_vm9, %v591_v16, -inf }
 0x406   :  { %594 = vmax.xlane.f32.xlu1 %v593_v17  ;;  %v911_v17 = vld [vmem:[#allocation2 + $0x380] sm:$0xff] }
 0x40d   :  { %v588_v30 = vpop.f32.mrf.mxu3 }
 0x40e   :  { %v592_v31 = vsel %vm326_vm8, %v588_v30, -inf  ;;  %v1039_v30 = vld [vmem:[#allocation2 + $0x780] sm:$0xff] }
 0x40f   :  { %v596_v18 = vsel %vm405_vm9, %v592_v31, -inf }
 0x410   :  { %597 = vmax.xlane.f32.xlu2 %v596_v18  ;;  %v903_v18 = vld [vmem:[#allocation2 + $0x340] sm:$0xff] }
 0x428   :  { %616 = vrot.lane.b32.xlu2 %v2595_v25, %s2256_s4  ;;  %v341_v25 = vld [vmem:[%s2943_s5 + $0x70] sm:$0xff] }
 0x429   :  { %687 = vmatpush.msrb.mxu0 %v341_v25  ;;  %v1007_v25 = vld [vmem:[#allocation2 + $0x680] sm:$0xff] }
 0x42b   :  { %688 = vmatpush.msrb.mxu0 %v339_v38  ;;  %v1008_v38 = vld [vmem:[#allocation2 + $0x688] sm:$0xff] }
 0x479   :  { %v595_v19 = vpop.xlane.xlu1 %594  ;;  %v497_v52 = vpop.f32.mrf.mxu0 }
 0x47a   :  { %v599_v21 = vsub.f32 %v591_v16, %v595_v19  ;;  %v520_v53 = vpop.f32.mrf.mxu1  ;;  %v531_v59 = vadd.f32 %v527_v57, %v497_v52  ;;  %v1048_v16 = vld [vmem:[#allocation2 + $0x7c8] sm:$0xff]  ;;  %v847_v52 = vld [vmem:[#allocation2 + $0x180] sm:$0xff] }
 0x47b   :  { %v532_v60 = vadd.f32 %v528_v58, %v520_v53  ;;  %1142 = vmatpush.msra.mxu1 %v1048_v16  ;;  %v904_v19 = vld [vmem:[#allocation2 + $0x348] sm:$0xff]  ;;  %v975_v53 = vld [vmem:[#allocation2 + $0x580] sm:$0xff] }
 0x47c   :  { %v601_v22 = vmul.f32 1.442695, %v599_v21  ;;  %v1032_v21 = vld [vmem:[#allocation2 + $0x748] sm:$0xff]  ;;  %v943_v16 = vld [vmem:[#allocation2 + $0x480] sm:$0xff] }
 0x47e   :  { %2159 = vpow2.f32 %v601_v22  ;;  %v895_v22 = vld [vmem:[#allocation2 + $0x300] sm:$0xff] }
 0x481   :  { %v500_v55 = vpop.f32.mrf.mxu0 }
 0x482   :  { %v523_v56 = vpop.f32.mrf.mxu1  ;;  %v533_v23 = vadd.f32 %v527_v57, %v500_v55  ;;  %v976_v57 = vld [vmem:[#allocation2 + $0x588] sm:$0xff] }
 0x483   :  { %v598_v26 = vpop.xlane.xlu2 %597  ;;  %v534_v24 = vadd.f32 %v528_v58, %v523_v56  ;;  %v848_v56 = vld [vmem:[#allocation2 + $0x188] sm:$0xff]  ;;  %v839_v58 = vld [vmem:[#allocation2 + $0x140] sm:$0xff] }
 0x484   :  { %v600_v27 = vsub.f32 %v592_v31, %v598_v26  ;;  %v2160_v28 = vpop.eup %2159  ;;  %v912_v31 = vld [vmem:[#allocation2 + $0x388] sm:$0xff]  ;;  %v1023_v26 = vld [vmem:[#allocation2 + $0x700] sm:$0xff] }
 0x485   :  { %v605_v32 = vsel %vm405_vm9, %v2160_v28, 0.0 }
 0x486   :  { %v603_v29 = vmul.f32 1.442695, %v600_v27  ;;  %606 = vadd.xlane.f32.xlu0 %v605_v32  ;;  %v896_v27 = vld [vmem:[#allocation2 + $0x308] sm:$0xff]  ;;  %v1015_v32 = vld [vmem:[#allocation2 + $0x6c0] sm:$0xff] }
 0x488   :  { %2161 = vpow2.f32 %v603_v29  ;;  %v887_v29 = vld [vmem:[#allocation2 + $0x2c0] sm:$0xff] }
 0x48b   :  { %v617_v34 = vpop.permute.xlu2 %616 }
 0x48c   :  { %637 = vmatpush.msrb.mxu2 %v617_v34  ;;  %v888_v34 = vld [vmem:[#allocation2 + $0x2c8] sm:$0xff] }
 0x48e   :  { %v2162_v35 = vpop.eup %2161 }
 0x48f   :  { %v608_v36 = vsel %vm405_vm9, %v2162_v35, 0.0 }
 0x490   :  { %609 = vadd.xlane.f32.xlu2 %v608_v36  ;;  %v879_v36 = vld [vmem:[#allocation2 + $0x280] sm:$0xff] }
 0x4a8   :  { %643 = vrot.lane.b32.xlu2 %v2599_v33, %s2256_s4  ;;  %v337_v33 = vld [vmem:[%s2943_s5 + $0x50] sm:$0xff] }
 0x4a9   :  { %689 = vmatpush.msrb.mxu0 %v337_v33  ;;  %v999_v33 = vld [vmem:[#allocation2 + $0x640] sm:$0xff] }
 0x4ab   :  { %690 = vmatpush.msrb.mxu0 %v335_v48  ;;  %v983_v48 = vld [vmem:[#allocation2 + $0x5c0] sm:$0xff] }
 0x4ad   :  { %1119 = vmatpush.msra.mxu0 %v920_v15  ;;  %v815_v15 = vld [vmem:[#allocation2 + $0x80] sm:$0xff] }
 0x4af   :  { %1120 = vmatpush.msra.mxu0 %v912_v31 }
 0x4b1   :  { %1121 = vmatpush.msra.mxu0 %v904_v19  ;;  %v808_v19 = vld [vmem:[#allocation2 + $0x48] sm:$0xff] }
 0x4b3   :  { %1122 = vmatpush.msra.mxu0 %v896_v27  ;;  %v799_v27 = vld [vmem:[#allocation2] sm:$0xff] }
 0x4b5   :  { %1123 = vmatpush.msra.mxu0 %v888_v34  ;;  %v928_v34 = vld [vmem:[#allocation2 + $0x408] sm:$0xff] }
 0x4b7   :  { %1124 = vmatpush.msra.mxu0 %v880_v37  ;;  %v1050_v37 = vld [vmem:[#allocation2 + $0x7d8] sm:$0xff] }
 0x4b9   :  { %1125 = vmatpush.msra.mxu0 %v872_v40  ;;  %v1042_v40 = vld [vmem:[#allocation2 + $0x798] sm:$0xff] }
 0x4f9   :  { %v607_v41 = vpop.xlane.xlu0 %606 }
 0x4fa   :  { %2163 = vrcp.f32 %v607_v41  ;;  %v1000_v41 = vld [vmem:[#allocation2 + $0x648] sm:$0xff] }
 0x500   :  { %v2164_v42 = vpop.eup %2163 }
 0x501   :  { %v613_v43 = vmul.f32 %v2164_v42, %v2160_v28  ;;  %v1024_v28 = vld [vmem:[#allocation2 + $0x708] sm:$0xff]  ;;  %v863_v42 = vld [vmem:[#allocation2 + $0x200] sm:$0xff] }
 0x503   :  { %v610_v44 = vpop.xlane.xlu2 %609  ;;  %2129 = vmatmul.msk.f32.vlgmr.msrb.gmra.mxu2 %vm405_vm9, %v613_v43  ;;  %v991_v43 = vld [vmem:[#allocation2 + $0x600] sm:$0xff] }
 0x504   :  { %2165 = vrcp.f32 %v610_v44  ;;  %v864_v44 = vld [vmem:[#allocation2 + $0x208] sm:$0xff] }
 0x505   :  { %1126 = vmatpush.msra.mxu0 %v864_v44  ;;  %v1034_v44 = vld [vmem:[#allocation2 + $0x758] sm:$0xff] }
 0x50a   :  { %v2166_v45 = vpop.eup %2165 }
 0x50b   :  { %v614_v46 = vmul.f32 %v2166_v45, %v2162_v35  ;;  %v644_v47 = vpop.permute.xlu2 %643  ;;  %v1016_v35 = vld [vmem:[#allocation2 + $0x6c8] sm:$0xff] }
 0x50c   :  { %664 = vmatpush.msrb.mxu3 %v644_v47  ;;  %v992_v45 = vld [vmem:[#allocation2 + $0x608] sm:$0xff]  ;;  %v855_v47 = vld [vmem:[#allocation2 + $0x1c0] sm:$0xff] }
 0x50d   :  { %2130 = vmatmul.msk.f32.vlgmr.msrb.gmra.mxu3 %vm405_vm9, %v614_v46 }
 0x50e   :  { %1096 = vmatpush.msra.mxu3 %v1047_v14  ;;  %v952_v14 = vld [vmem:[#allocation2 + $0x4c8] sm:$0xff] }
 0x510   :  { %1097 = vmatpush.msra.mxu3 %v1039_v30 }
 0x586   :  { %v639_v50 = vpop.f32.mrf.mxu2 }
 0x587   :  { %2131 = vmatmul.msk.f32.vlgmr.msrb.gmra.mxu0 %vm347_vm7, %v639_v50  ;;  %2133 = vmatmul.msk.f32.vlgmr.msrb.gmra.mxu1 %vm347_vm7, %v639_v50  ;;  %v856_v50 = vld [vmem:[#allocation2 + $0x1c8] sm:$0xff] }
 0x588   :  { %1127 = vmatpush.msra.mxu0 %v856_v50  ;;  %v1017_v50 = vld [vmem:[#allocation2 + $0x6d0] sm:$0xff] }
 0x58a   :  { %1128 = vmatpush.msra.mxu0 %v848_v56  ;;  %v1009_v56 = vld [vmem:[#allocation2 + $0x690] sm:$0xff] }
 0x590   :  { %v666_v51 = vpop.f32.mrf.mxu3 }
 0x591   :  { %2132 = vmatmul.msk.f32.gmra.mxu0 %vm347_vm7, %v666_v51  ;;  %2134 = vmatmul.msk.f32.gmra.mxu1 %vm347_vm7, %v666_v51  ;;  %v984_v51 = vld [vmem:[#allocation2 + $0x5c8] sm:$0xff] }
 0x604   :  { %v692_v61 = vpop.f32.mrf.mxu0  ;;  %v715_v62 = vpop.f32.mrf.mxu1 }
 0x605   :  { %v721_v63 = vadd.f32 %v692_v61, %v531_v59  ;;  %v722_v2 = vadd.f32 %v715_v62, %v532_v60  ;;  %v967_v59 = vld [vmem:[#allocation2 + $0x540] sm:$0xff]  ;;  %v840_v62 = vld [vmem:[#allocation2 + $0x148] sm:$0xff] }
 0x606   :  { %1129 = vmatpush.msra.mxu0 %v840_v62  ;;  %v1002_v62 = vld [vmem:[#allocation2 + $0x658] sm:$0xff] }
 0x607   :  { %v2706_v5 = vadd.f32 %v721_v63, %v2342_v0  ;;  %v2709_v6 = vadd.f32 %v722_v2, %v2347_v1  ;;  %v919_v1 = vld [vmem:[#allocation2 + $0x3c0] sm:$0xff]  ;;  %v968_v63 = vld [vmem:[#allocation2 + $0x548] sm:$0xff] }
 0x608   :  { %1073 = vmatpush.msra.mxu2 %v919_v1  ;;  %v831_v2 = vld [vmem:[#allocation2 + $0x100] sm:$0xff] }
 0x609   :  { %v731_v7 = vadd.f32 %v2709_v6, %v2706_v5 }
 0x60a   :  { %1074 = vmatpush.msra.mxu2 %v911_v17  ;;  %v816_v17 = vld [vmem:[#allocation2 + $0x88] sm:$0xff] }
 0x60b   :  { %732 = vadd.xlane.f32.xlu1 %v731_v7 }
 0x60c   :  { %1075 = vmatpush.msra.mxu2 %v903_v18  ;;  %v807_v18 = vld [vmem:[#allocation2 + $0x40] sm:$0xff] }
 0x60e   :  { %v695_v8 = vpop.f32.mrf.mxu0  ;;  %v718_v9 = vpop.f32.mrf.mxu1  ;;  %1076 = vmatpush.msra.mxu2 %v895_v22 }
 0x60f   :  { %v723_v10 = vadd.f32 %v695_v8, %v533_v23  ;;  %v724_v11 = vadd.f32 %v718_v9, %v534_v24  ;;  %v959_v23 = vld [vmem:[#allocation2 + $0x500] sm:$0xff]  ;;  %v832_v24 = vld [vmem:[#allocation2 + $0x108] sm:$0xff] }
 0x610   :  { %1077 = vmatpush.msra.mxu2 %v887_v29  ;;  %v960_v8 = vld [vmem:[#allocation2 + $0x508] sm:$0xff]  ;;  %v823_v9 = vld [vmem:[#allocation2 + $0xc0] sm:$0xff]  ;;  %1130 = vmatpush.msra.mxu0 %v832_v24  ;;  %v857_v24 = vld [vmem:[#allocation2 + $0x1d0] sm:$0xff] }
 0x611   :  { %v2714_v12 = vadd.f32 %v723_v10, %v2354_v3  ;;  %v2717_v13 = vadd.f32 %v724_v11, %v2359_v4  ;;  %v1040_v3 = vld [vmem:[#allocation2 + $0x788] sm:$0xff]  ;;  %v1031_v4 = vld [vmem:[#allocation2 + $0x740] sm:$0xff] }
 0x612   :  { %1143 = vmatpush.msra.mxu1 %v1040_v3  ;;  %1098 = vmatpush.msra.mxu3 %v1031_v4  ;;  %v951_v11 = vld [vmem:[#allocation2 + $0x4c0] sm:$0xff]  ;;  %v944_v3 = vld [vmem:[#allocation2 + $0x488] sm:$0xff] }
 0x613   :  { %v734_v0 = vadd.f32 %v2717_v13, %v2714_v12  ;;  %1078 = vmatpush.msra.mxu2 %v879_v36  ;;  %v935_v4 = vld [vmem:[#allocation2 + $0x440] sm:$0xff]  ;;  %v1049_v36 = vld [vmem:[#allocation2 + $0x7d0] sm:$0xff] }
 0x614   :  { %1144 = vmatpush.msra.mxu1 %v1032_v21  ;;  %1099 = vmatpush.msra.mxu3 %v1023_v26  ;;  %v936_v26 = vld [vmem:[#allocation2 + $0x448] sm:$0xff] }
 0x615   :  { %735 = vadd.xlane.f32.xlu0 %v734_v0  ;;  %1079 = vmatpush.msra.mxu2 %v871_v39  ;;  %v824_v0 = vld [vmem:[#allocation2 + $0xc8] sm:$0xff]  ;;  %v1041_v39 = vld [vmem:[#allocation2 + $0x790] sm:$0xff] }
 0x616   :  { %1145 = vmatpush.msra.mxu1 %v1024_v28  ;;  %1100 = vmatpush.msra.mxu3 %v1015_v32  ;;  %v927_v28 = vld [vmem:[#allocation2 + $0x400] sm:$0xff]  ;;  %v800_v32 = vld [vmem:[#allocation2 + $0x8] sm:$0xff] }
 0x617   :  { %1080 = vmatpush.msra.mxu2 %v863_v42  ;;  %1131 = vmatpush.msra.mxu0 %v824_v0  ;;  %v1033_v42 = vld [vmem:[#allocation2 + $0x750] sm:$0xff] }
 0x618   :  { %1146 = vmatpush.msra.mxu1 %v1016_v35  ;;  %1101 = vmatpush.msra.mxu3 %v1007_v25  ;;  %v921_v35 = vld [vmem:[#allocation2 + $0x3d0] sm:$0xff]  ;;  %v922_v25 = vld [vmem:[#allocation2 + $0x3d8] sm:$0xff] }
 0x619   :  { %1081 = vmatpush.msra.mxu2 %v855_v47  ;;  %1132 = vmatpush.msra.mxu0 %v816_v17  ;;  %v898_v47 = vld [vmem:[#allocation2 + $0x318] sm:$0xff]  ;;  %v977_v0 = vld [vmem:[#allocation2 + $0x590] sm:$0xff] }
 0x61a   :  { %1147 = vmatpush.msra.mxu1 %v1008_v38  ;;  %1102 = vmatpush.msra.mxu3 %v999_v33  ;;  %v913_v38 = vld [vmem:[#allocation2 + $0x390] sm:$0xff]  ;;  %v914_v33 = vld [vmem:[#allocation2 + $0x398] sm:$0xff] }
 0x61b   :  { %1082 = vmatpush.msra.mxu2 %v847_v52  ;;  %1133 = vmatpush.msra.mxu0 %v808_v19  ;;  %v1018_v52 = vld [vmem:[#allocation2 + $0x6d8] sm:$0xff] }
 0x61c   :  { %1148 = vmatpush.msra.mxu1 %v1000_v41  ;;  %1103 = vmatpush.msra.mxu3 %v991_v43  ;;  %v905_v41 = vld [vmem:[#allocation2 + $0x350] sm:$0xff]  ;;  %v906_v43 = vld [vmem:[#allocation2 + $0x358] sm:$0xff] }
 0x61d   :  { %1083 = vmatpush.msra.mxu2 %v839_v58  ;;  %1134 = vmatpush.msra.mxu0 %v800_v32  ;;  %v1010_v58 = vld [vmem:[#allocation2 + $0x698] sm:$0xff]  ;;  %v945_v32 = vld [vmem:[#allocation2 + $0x490] sm:$0xff] }
 0x61e   :  { %1149 = vmatpush.msra.mxu1 %v992_v45  ;;  %1104 = vmatpush.msra.mxu3 %v983_v48  ;;  %v897_v45 = vld [vmem:[#allocation2 + $0x310] sm:$0xff]  ;;  %v1026_v48 = vld [vmem:[#allocation2 + $0x718] sm:$0xff] }
 0x61f   :  { %1084 = vmatpush.msra.mxu2 %v831_v2  ;;  %1211 = vmatpush.msrb.mxu0 %v922_v25  ;;  %v993_v2 = vld [vmem:[#allocation2 + $0x610] sm:$0xff]  ;;  %v842_v17 = vld [vmem:[#allocation2 + $0x158] sm:$0xff] }
 0x620   :  { %1150 = vmatpush.msra.mxu1 %v984_v51  ;;  %1105 = vmatpush.msra.mxu3 %v975_v53  ;;  %v890_v51 = vld [vmem:[#allocation2 + $0x2d8] sm:$0xff]  ;;  %v881_v53 = vld [vmem:[#allocation2 + $0x290] sm:$0xff] }
 0x621   :  { %1085 = vmatpush.msra.mxu2 %v823_v9  ;;  %1212 = vmatpush.msrb.mxu0 %v914_v33  ;;  %v858_v9 = vld [vmem:[#allocation2 + $0x1d8] sm:$0xff]  ;;  %v937_v25 = vld [vmem:[#allocation2 + $0x450] sm:$0xff] }
 0x622   :  { %1151 = vmatpush.msra.mxu1 %v976_v57  ;;  %1106 = vmatpush.msra.mxu3 %v967_v59  ;;  %v882_v57 = vld [vmem:[#allocation2 + $0x298] sm:$0xff]  ;;  %v873_v59 = vld [vmem:[#allocation2 + $0x250] sm:$0xff] }
 0x623   :  { %1086 = vmatpush.msra.mxu2 %v815_v15  ;;  %1213 = vmatpush.msrb.mxu0 %v906_v43  ;;  %v841_v15 = vld [vmem:[#allocation2 + $0x150] sm:$0xff]  ;;  %v834_v19 = vld [vmem:[#allocation2 + $0x118] sm:$0xff] }
 0x624   :  { %1152 = vmatpush.msra.mxu1 %v968_v63  ;;  %1107 = vmatpush.msra.mxu3 %v959_v23  ;;  %v865_v63 = vld [vmem:[#allocation2 + $0x210] sm:$0xff]  ;;  %v994_v23 = vld [vmem:[#allocation2 + $0x618] sm:$0xff] }
 0x625   :  { %1087 = vmatpush.msra.mxu2 %v807_v18  ;;  %1214 = vmatpush.msrb.mxu0 %v898_v47  ;;  %v833_v18 = vld [vmem:[#allocation2 + $0x110] sm:$0xff] }
 0x626   :  { %1153 = vmatpush.msra.mxu1 %v960_v8  ;;  %1108 = vmatpush.msra.mxu3 %v951_v11  ;;  %v985_v8 = vld [vmem:[#allocation2 + $0x5d0] sm:$0xff] }
 0x627   :  { %1088 = vmatpush.msra.mxu2 %v799_v27  ;;  %1215 = vmatpush.msrb.mxu0 %v890_v51  ;;  %v849_v11 = vld [vmem:[#allocation2 + $0x190] sm:$0xff]  ;;  %v826_v27 = vld [vmem:[#allocation2 + $0xd8] sm:$0xff] }
 0x628   :  { %1154 = vmatpush.msra.mxu1 %v952_v14  ;;  %1109 = vmatpush.msra.mxu3 %v943_v16  ;;  %v978_v14 = vld [vmem:[#allocation2 + $0x598] sm:$0xff]  ;;  %v969_v16 = vld [vmem:[#allocation2 + $0x550] sm:$0xff] }
 0x629   :  { %1165 = vmatpush.msrb.mxu2 %v921_v35  ;;  %1216 = vmatpush.msrb.mxu0 %v882_v57  ;;  %v946_v35 = vld [vmem:[#allocation2 + $0x498] sm:$0xff]  ;;  %v929_v33 = vld [vmem:[#allocation2 + $0x410] sm:$0xff] }
 0x62a   :  { %1155 = vmatpush.msra.mxu1 %v944_v3  ;;  %1110 = vmatpush.msra.mxu3 %v935_v4  ;;  %v970_v3 = vld [vmem:[#allocation2 + $0x558] sm:$0xff]  ;;  %v961_v4 = vld [vmem:[#allocation2 + $0x510] sm:$0xff] }
 0x62b   :  { %1166 = vmatpush.msrb.mxu2 %v913_v38  ;;  %v938_v38 = vld [vmem:[#allocation2 + $0x458] sm:$0xff] }
 0x62c   :  { %1156 = vmatpush.msra.mxu1 %v936_v26  ;;  %1111 = vmatpush.msra.mxu3 %v927_v28  ;;  %v953_v26 = vld [vmem:[#allocation2 + $0x4d0] sm:$0xff]  ;;  %v954_v28 = vld [vmem:[#allocation2 + $0x4d8] sm:$0xff] }
 0x62d   :  { %1167 = vmatpush.msrb.mxu2 %v905_v41  ;;  %v930_v41 = vld [vmem:[#allocation2 + $0x418] sm:$0xff] }
 0x62e   :  { %1157 = vmatpush.msra.mxu1 %v928_v34  ;;  %1188 = vmatpush.msrb.mxu3 %v1049_v36  ;;  %v818_v34 = vld [vmem:[#allocation2 + $0x98] sm:$0xff]  ;;  %v809_v36 = vld [vmem:[#allocation2 + $0x50] sm:$0xff] }
 0x62f   :  { %1168 = vmatpush.msrb.mxu2 %v897_v45 }
 0x630   :  { %1234 = vmatpush.msrb.mxu1 %v1050_v37  ;;  %1189 = vmatpush.msrb.mxu3 %v1041_v39  ;;  %v810_v37 = vld [vmem:[#allocation2 + $0x58] sm:$0xff]  ;;  %v801_v39 = vld [vmem:[#allocation2 + $0x10] sm:$0xff] }
 0x632   :  { %1235 = vmatpush.msrb.mxu1 %v1042_v40  ;;  %1190 = vmatpush.msrb.mxu3 %v1033_v42  ;;  %v802_v40 = vld [vmem:[#allocation2 + $0x18] sm:$0xff] }
 0x634   :  { %1236 = vmatpush.msrb.mxu1 %v1034_v44 }
 0x636   :  { %1237 = vmatpush.msrb.mxu1 %v1026_v48 }
 0x638   :  { %1238 = vmatpush.msrb.mxu1 %v1018_v52  ;;  %v729_v52 = vld [vmem:[%s2945_s7] sm:$0x3] }
 0x63a   :  { %1239 = vmatpush.msrb.mxu1 %v1010_v58 }
 0x63c   :  { %1240 = vmatpush.msrb.mxu1 %v1002_v62 }
 0x63e   :  { %1241 = vmatpush.msrb.mxu1 %v994_v23 }
 0x67e   :  { %v733_v46 = vpop.xlane.xlu1 %732 }
 0x67f   :  { %v737_v49 = vmul.f32 %v733_v46, %v2387_v20  ;;  %v1025_v46 = vld [vmem:[#allocation2 + $0x710] sm:$0xff] }
 0x680   :  { %1191 = vmatpush.msrb.mxu3 %v1025_v46 }
 0x681   :  { %v2723_v54 = vsub.f32 %v2706_v5, %v737_v49  ;;  %v2726_v55 = vsub.f32 %v2709_v6, %v737_v49  ;;  %v889_v49 = vld [vmem:[#allocation2 + $0x2d0] sm:$0xff] }
 0x682   :  { %1169 = vmatpush.msrb.mxu2 %v889_v49  ;;  %1192 = vmatpush.msrb.mxu3 %v1017_v50 }
 0x683   :  { %v743_v60 = vmul.f32 %v2723_v54, %v2723_v54  ;;  %v744_v61 = vmul.f32 %v2726_v55, %v2726_v55 }
 0x684   :  { %1170 = vmatpush.msrb.mxu2 %v881_v53  ;;  %1193 = vmatpush.msrb.mxu3 %v1009_v56  ;;  %v2751_v56 = vld [vmem:[%s2946_s8] sm:$0x3] }
 0x685   :  { %v747_v7 = vadd.f32 %v744_v61, %v743_v60  ;;  %v1001_v60 = vld [vmem:[#allocation2 + $0x650] sm:$0xff]  ;;  %v874_v61 = vld [vmem:[#allocation2 + $0x258] sm:$0xff] }
 0x686   :  { %1171 = vmatpush.msrb.mxu2 %v873_v59  ;;  %1194 = vmatpush.msrb.mxu3 %v1001_v60  ;;  %v783_v59 = vperm.slane %v729_v52, 1 }
 0x687   :  { %748 = vadd.xlane.f32.xlu2 %v747_v7  ;;  %1217 = vmatpush.msrb.mxu0 %v874_v61  ;;  %v866_v7 = vld [vmem:[#allocation2 + $0x218] sm:$0xff]  ;;  %v791_v61 = vperm.slane %v2751_v56, 0 }
 0x688   :  { %v736_v10 = vpop.xlane.xlu0 %735  ;;  %1172 = vmatpush.msrb.mxu2 %v865_v63  ;;  %1195 = vmatpush.msrb.mxu3 %v993_v2  ;;  %v792_v63 = vperm.slane %v2751_v56, 1  ;;  %v860_v56 = vld [vmem:[#allocation2 + $0x1e8] sm:$0xff] }
 0x689   :  { %v738_v1 = vmul.f32 %v736_v10, %v2387_v20  ;;  %1218 = vmatpush.msrb.mxu0 %v866_v7  ;;  %v986_v10 = vld [vmem:[#allocation2 + $0x5d8] sm:$0xff] }
 0x68a   :  { %1173 = vmatpush.msrb.mxu2 %v857_v24  ;;  %1196 = vmatpush.msrb.mxu3 %v985_v8 }
 0x68b   :  { %v2734_v30 = vsub.f32 %v2714_v12, %v738_v1  ;;  %v2737_v31 = vsub.f32 %v2717_v13, %v738_v1  ;;  %1219 = vmatpush.msrb.mxu0 %v858_v9  ;;  %1242 = vmatpush.msrb.mxu1 %v986_v10  ;;  %v850_v1 = vld [vmem:[#allocation2 + $0x198] sm:$0xff] }
 0x68c   :  { %1174 = vmatpush.msrb.mxu2 %v849_v11  ;;  %1197 = vmatpush.msrb.mxu3 %v977_v0 }
 0x68d   :  { %v745_v21 = vmul.f32 %v2734_v30, %v2734_v30  ;;  %v746_v22 = vmul.f32 %v2737_v31, %v2737_v31  ;;  %1220 = vmatpush.msrb.mxu0 %v850_v1  ;;  %1243 = vmatpush.msrb.mxu1 %v978_v14  ;;  %v923_v1 = vld [vmem:[#allocation2 + $0x3e0] sm:$0xff] }
 0x68e   :  { %1175 = vmatpush.msrb.mxu2 %v841_v15  ;;  %1198 = vmatpush.msrb.mxu3 %v969_v16  ;;  %v1051_v14 = vld [vmem:[#allocation2 + $0x7e0] sm:$0xff] }
 0x68f   :  { %v750_v29 = vadd.f32 %v746_v22, %v745_v21  ;;  %1221 = vmatpush.msrb.mxu0 %v842_v17  ;;  %1244 = vmatpush.msrb.mxu1 %v970_v3  ;;  %v962_v21 = vld [vmem:[#allocation2 + $0x518] sm:$0xff]  ;;  %v825_v22 = vld [vmem:[#allocation2 + $0xd0] sm:$0xff]  ;;  %v915_v16 = vld [vmem:[#allocation2 + $0x3a0] sm:$0xff] }
 0x690   :  { %1176 = vmatpush.msrb.mxu2 %v833_v18  ;;  %1199 = vmatpush.msrb.mxu3 %v961_v4  ;;  %v1043_v17 = vld [vmem:[#allocation2 + $0x7a0] sm:$0xff]  ;;  %v916_v18 = vld [vmem:[#allocation2 + $0x3a8] sm:$0xff] }
 0x691   :  { %751 = vadd.xlane.f32.xlu1 %v750_v29  ;;  %1222 = vmatpush.msrb.mxu0 %v834_v19  ;;  %v817_v29 = vld [vmem:[#allocation2 + $0x90] sm:$0xff]  ;;  %v1044_v4 = vld [vmem:[#allocation2 + $0x7a8] sm:$0xff] }
 0x692   :  { %1245 = vmatpush.msrb.mxu1 %v962_v21  ;;  %1177 = vmatpush.msrb.mxu2 %v825_v22  ;;  %v907_v22 = vld [vmem:[#allocation2 + $0x360] sm:$0xff] }
 0x693   :  { %1200 = vmatpush.msrb.mxu3 %v953_v26  ;;  %1223 = vmatpush.msrb.mxu0 %v826_v27  ;;  %v1035_v26 = vld [vmem:[#allocation2 + $0x760] sm:$0xff]  ;;  %v908_v27 = vld [vmem:[#allocation2 + $0x368] sm:$0xff] }
 0x694   :  { %1246 = vmatpush.msrb.mxu1 %v954_v28  ;;  %1178 = vmatpush.msrb.mxu2 %v817_v29  ;;  %v1036_v28 = vld [vmem:[#allocation2 + $0x768] sm:$0xff] }
 0x695   :  { %1201 = vmatpush.msrb.mxu3 %v945_v32  ;;  %1224 = vmatpush.msrb.mxu0 %v818_v34  ;;  %v899_v34 = vld [vmem:[#allocation2 + $0x320] sm:$0xff] }
 0x696   :  { %1247 = vmatpush.msrb.mxu1 %v946_v35  ;;  %1179 = vmatpush.msrb.mxu2 %v809_v36  ;;  %v1027_v35 = vld [vmem:[#allocation2 + $0x720] sm:$0xff]  ;;  %v900_v36 = vld [vmem:[#allocation2 + $0x328] sm:$0xff] }
 0x697   :  { %1202 = vmatpush.msrb.mxu3 %v937_v25  ;;  %1225 = vmatpush.msrb.mxu0 %v810_v37  ;;  %v1019_v25 = vld [vmem:[#allocation2 + $0x6e0] sm:$0xff] }
 0x698   :  { %1248 = vmatpush.msrb.mxu1 %v938_v38  ;;  %1180 = vmatpush.msrb.mxu2 %v801_v39  ;;  %v892_v39 = vld [vmem:[#allocation2 + $0x2e8] sm:$0xff] }
 0x699   :  { %1203 = vmatpush.msrb.mxu3 %v929_v33  ;;  %1226 = vmatpush.msrb.mxu0 %v802_v40  ;;  %v1020_v33 = vld [vmem:[#allocation2 + $0x6e8] sm:$0xff]  ;;  %v883_v40 = vld [vmem:[#allocation2 + $0x2a0] sm:$0xff] }
 0x69a   :  { %1249 = vmatpush.msrb.mxu1 %v930_v41  ;;  %v1011_v41 = vld [vmem:[#allocation2 + $0x6a0] sm:$0xff] }
 0x6fa   :  { %v749_v42 = vpop.xlane.xlu2 %748 }
 0x6fb   :  { %v753_v43 = vmul.f32 %v749_v42, %v2387_v20  ;;  %v884_v42 = vld [vmem:[#allocation2 + $0x2a8] sm:$0xff] }
 0x6fd   :  { %v755_v44 = vadd.f32 1e-05, %v753_v43  ;;  %v1012_v43 = vld [vmem:[#allocation2 + $0x6a8] sm:$0xff] }
 0x6ff   :  { %2167 = vrsqrt.f32 %v755_v44  ;;  %vm763_vm11 = vweird.f32 %v755_v44 }
 0x704   :  { %v752_v45 = vpop.xlane.xlu1 %751 }
 0x705   :  { %v754_v46 = vmul.f32 %v752_v45, %v2387_v20  ;;  %v2168_v47 = vpop.eup %2167  ;;  %v782_v20 = vperm.slane %v729_v52, 0  ;;  %v1003_v45 = vld [vmem:[#allocation2 + $0x660] sm:$0xff] }
 0x706   :  { %v758_v48 = vmul.f32 %v2168_v47, %v755_v44  ;;  %vm764_vm10 = vweird.f32 %v2168_v47  ;;  %v875_v44 = vld [vmem:[#allocation2 + $0x260] sm:$0xff] }
 0x707   :  { %v756_v49 = vadd.f32 1e-05, %v754_v46  ;;  %vm765_vm12 = vmor %vm763_vm11, %vm764_vm10  ;;  %v876_v46 = vld [vmem:[#allocation2 + $0x268] sm:$0xff]  ;;  %v859_v52 = vld [vmem:[#allocation2 + $0x1e0] sm:$0xff] }
 0x708   :  { %v759_v50 = vmul.f32 %v2168_v47, %v758_v48  ;;  %v867_v48 = vld [vmem:[#allocation2 + $0x220] sm:$0xff] }
 0x709   :  { %2169 = vrsqrt.f32 %v756_v49  ;;  %vm773_vm14 = vweird.f32 %v756_v49 }
 0x70a   :  { %v760_v51 = vmul.f32 0.5, %v759_v50  ;;  %v868_v50 = vld [vmem:[#allocation2 + $0x228] sm:$0xff] }
 0x70c   :  { %v761_v53 = vsub.f32 1.5, %v760_v51  ;;  %v996_v51 = vld [vmem:[#allocation2 + $0x628] sm:$0xff] }
 0x70e   :  { %v762_v58 = vmul.f32 %v2168_v47, %v761_v53  ;;  %v987_v53 = vld [vmem:[#allocation2 + $0x5e0] sm:$0xff] }
 0x70f   :  { %v2170_v57 = vpop.eup %2169 }
 0x710   :  { %v768_v60 = vmul.f32 %v2170_v57, %v756_v49  ;;  %v766_v62 = vsel %vm765_vm12, %v2168_v47, %v762_v58  ;;  %vm774_vm13 = vweird.f32 %v2170_v57  ;;  %v1004_v47 = vld [vmem:[#allocation2 + $0x668] sm:$0xff]  ;;  %v995_v49 = vld [vmem:[#allocation2 + $0x620] sm:$0xff] }
 0x711   :  { %v777_v2 = vmul.f32 %v766_v62, %v2723_v54  ;;  %v778_v7 = vmul.f32 %v766_v62, %v2726_v55  ;;  %v924_v54 = vld [vmem:[#allocation2 + $0x3e8] sm:$0xff]  ;;  %vm775_vm15 = vmor %vm773_vm14, %vm774_vm13  ;;  %v851_v58 = vld [vmem:[#allocation2 + $0x1a0] sm:$0xff] }
 0x712   :  { %v769_v23 = vmul.f32 %v2170_v57, %v768_v60  ;;  %v1052_v55 = vld [vmem:[#allocation2 + $0x7e8] sm:$0xff]  ;;  %v971_v62 = vld [vmem:[#allocation2 + $0x560] sm:$0xff] }
 0x713   :  { %v786_v24 = vmul.f32 %v782_v20, %v777_v2  ;;  %v787_v8 = vmul.f32 %v783_v59, %v778_v7  ;;  %v980_v60 = vld [vmem:[#allocation2 + $0x5a8] sm:$0xff]  ;;  %v835_v7 = vld [vmem:[#allocation2 + $0x120] sm:$0xff] }
 0x714   :  { %v770_v9 = vmul.f32 0.5, %v769_v23  ;;  %v972_v2 = vld [vmem:[#allocation2 + $0x568] sm:$0xff]  ;;  %v963_v23 = vld [vmem:[#allocation2 + $0x520] sm:$0xff] }
 0x715   :  { %v2757_v10 = vadd.f32 %v791_v61, %v786_v24  ;;  %v2759_v11 = vadd.f32 %v792_v63, %v787_v8  ;;  %v836_v24 = vld [vmem:[#allocation2 + $0x128] sm:$0xff] }
 0x716   :  { %v771_v0 = vsub.f32 1.5, %v770_v9  ;;  %v964_v8 = vld [vmem:[#allocation2 + $0x528] sm:$0xff]  ;;  %v827_v9 = vld [vmem:[#allocation2 + $0xe0] sm:$0xff] }
 0x717   :  { %1089 = vmatmul.f32.vlgmr.msra.gmra.mxu2 %v2757_v10  ;;  %1112 = vmatmul.f32.vlgmr.msra.gmra.mxu3 %v2759_v11 }
 0x718   :  { %v772_v15 = vmul.f32 %v2170_v57, %v771_v0  ;;  %1135 = vmatmul.f32.vlgmr.msra.gmra.mxu0 %v2757_v10  ;;  %1158 = vmatmul.f32.vlgmr.msra.gmra.mxu1 %v2759_v11  ;;  %v955_v0 = vld [vmem:[#allocation2 + $0x4e0] sm:$0xff] }
 0x719   :  { %1257 = vmatpush.msra.mxu2 %v923_v1  ;;  %1280 = vmatpush.msra.mxu3 %v1051_v14  ;;  %v828_v1 = vld [vmem:[#allocation2 + $0xe8] sm:$0xff] }
 0x71a   :  { %v776_v3 = vsel %vm775_vm15, %v2170_v57, %v772_v15  ;;  %1303 = vmatpush.msra.mxu0 %v924_v54  ;;  %1326 = vmatpush.msra.mxu1 %v1052_v55  ;;  %v988_v57 = vld [vmem:[#allocation2 + $0x5e8] sm:$0xff]  ;;  %v819_v15 = vld [vmem:[#allocation2 + $0xa0] sm:$0xff] }
 0x71b   :  { %v779_v19 = vmul.f32 %v776_v3, %v2734_v30  ;;  %v780_v21 = vmul.f32 %v776_v3, %v2737_v31  ;;  %1258 = vmatpush.msra.mxu2 %v915_v16  ;;  %1281 = vmatpush.msra.mxu3 %v1043_v17  ;;  %v1028_v30 = vld [vmem:[#allocation2 + $0x728] sm:$0xff]  ;;  %v891_v31 = vld [vmem:[#allocation2 + $0x2e0] sm:$0xff] }
 0x71c   :  { %1304 = vmatpush.msra.mxu0 %v916_v18  ;;  %1327 = vmatpush.msra.mxu1 %v1044_v4  ;;  %v956_v14 = vld [vmem:[#allocation2 + $0x4e8] sm:$0xff]  ;;  %v947_v54 = vld [vmem:[#allocation2 + $0x4a0] sm:$0xff] }
 0x71d   :  { %v788_v29 = vmul.f32 %v782_v20, %v779_v19  ;;  %v789_v32 = vmul.f32 %v783_v59, %v780_v21  ;;  %1259 = vmatpush.msra.mxu2 %v907_v22  ;;  %1282 = vmatpush.msra.mxu3 %v1035_v26  ;;  %v979_v20 = vld [vmem:[#allocation2 + $0x5a0] sm:$0xff]  ;;  %v852_v59 = vld [vmem:[#allocation2 + $0x1a8] sm:$0xff] }
 0x71e   :  { %1305 = vmatpush.msra.mxu0 %v908_v27  ;;  %1328 = vmatpush.msra.mxu1 %v1036_v28  ;;  %v820_v55 = vld [vmem:[#allocation2 + $0xa8] sm:$0xff]  ;;  %v811_v17 = vld [vmem:[#allocation2 + $0x60] sm:$0xff]  ;;  %v925_v27 = vld [vmem:[#allocation2 + $0x3f0] sm:$0xff] }
 0x71f   :  { %v2767_v37 = vadd.f32 %v791_v61, %v788_v29  ;;  %v2769_v38 = vadd.f32 %v792_v63, %v789_v32  ;;  %1260 = vmatpush.msra.mxu2 %v899_v34  ;;  %1283 = vmatpush.msra.mxu3 %v1027_v35  ;;  %v843_v61 = vld [vmem:[#allocation2 + $0x160] sm:$0xff]  ;;  %v844_v63 = vld [vmem:[#allocation2 + $0x168] sm:$0xff]  ;;  %v1053_v28 = vld [vmem:[#allocation2 + $0x7f0] sm:$0xff] }
 0x720   :  { %1306 = vmatpush.msra.mxu0 %v900_v36  ;;  %1329 = vmatpush.msra.mxu1 %v1028_v30  ;;  %v948_v16 = vld [vmem:[#allocation2 + $0x4a8] sm:$0xff]  ;;  %v939_v3 = vld [vmem:[#allocation2 + $0x460] sm:$0xff]  ;;  %v926_v29 = vld [vmem:[#allocation2 + $0x3f8] sm:$0xff] }
 0x721   :  { %1261 = vmatpush.msra.mxu2 %v891_v31  ;;  %1284 = vmatpush.msra.mxu3 %v1019_v25  ;;  %v812_v18 = vld [vmem:[#allocation2 + $0x68] sm:$0xff]  ;;  %v803_v19 = vld [vmem:[#allocation2 + $0x20] sm:$0xff]  ;;  %v1054_v32 = vld [vmem:[#allocation2 + $0x7f8] sm:$0xff] }
 0x722   :  { %1307 = vmatpush.msra.mxu0 %v892_v39  ;;  %1330 = vmatpush.msra.mxu1 %v1020_v33  ;;  %v940_v4 = vld [vmem:[#allocation2 + $0x468] sm:$0xff]  ;;  %v931_v21 = vld [vmem:[#allocation2 + $0x420] sm:$0xff]  ;;  %v917_v34 = vld [vmem:[#allocation2 + $0x3b0] sm:$0xff] }
 0x723   :  { %1092 = vmatmul.f32.gmra.mxu2 %v2767_v37  ;;  %1115 = vmatmul.f32.gmra.mxu3 %v2769_v38  ;;  %v804_v22 = vld [vmem:[#allocation2 + $0x28] sm:$0xff]  ;;  %v1045_v35 = vld [vmem:[#allocation2 + $0x7b0] sm:$0xff]  ;;  %v918_v36 = vld [vmem:[#allocation2 + $0x3b8] sm:$0xff] }
 0x724   :  { %1138 = vmatmul.f32.gmra.mxu0 %v2767_v37  ;;  %1161 = vmatmul.f32.gmra.mxu1 %v2769_v38  ;;  %v932_v26 = vld [vmem:[#allocation2 + $0x428] sm:$0xff]  ;;  %v1046_v30 = vld [vmem:[#allocation2 + $0x7b8] sm:$0xff]  ;;  %v909_v31 = vld [vmem:[#allocation2 + $0x370] sm:$0xff] }
 0x725   :  { %1262 = vmatpush.msra.mxu2 %v883_v40  ;;  %1285 = vmatpush.msra.mxu3 %v1011_v41  ;;  %v1037_v25 = vld [vmem:[#allocation2 + $0x770] sm:$0xff]  ;;  %v910_v39 = vld [vmem:[#allocation2 + $0x378] sm:$0xff] }
 0x726   :  { %1308 = vmatpush.msra.mxu0 %v884_v42  ;;  %1331 = vmatpush.msra.mxu1 %v1012_v43  ;;  %v1038_v33 = vld [vmem:[#allocation2 + $0x778] sm:$0xff]  ;;  %v901_v40 = vld [vmem:[#allocation2 + $0x330] sm:$0xff] }
 0x727   :  { %1263 = vmatpush.msra.mxu2 %v875_v44  ;;  %1286 = vmatpush.msra.mxu3 %v1003_v45  ;;  %v1029_v41 = vld [vmem:[#allocation2 + $0x730] sm:$0xff]  ;;  %v902_v42 = vld [vmem:[#allocation2 + $0x338] sm:$0xff] }
 0x728   :  { %1309 = vmatpush.msra.mxu0 %v876_v46  ;;  %1332 = vmatpush.msra.mxu1 %v1004_v47  ;;  %v1030_v43 = vld [vmem:[#allocation2 + $0x738] sm:$0xff]  ;;  %v893_v44 = vld [vmem:[#allocation2 + $0x2f0] sm:$0xff] }
 0x729   :  { %1264 = vmatpush.msra.mxu2 %v867_v48  ;;  %1287 = vmatpush.msra.mxu3 %v995_v49  ;;  %v1021_v45 = vld [vmem:[#allocation2 + $0x6f0] sm:$0xff]  ;;  %v894_v46 = vld [vmem:[#allocation2 + $0x2f8] sm:$0xff] }
 0x72a   :  { %1310 = vmatpush.msra.mxu0 %v868_v50  ;;  %1333 = vmatpush.msra.mxu1 %v996_v51  ;;  %v1022_v47 = vld [vmem:[#allocation2 + $0x6f8] sm:$0xff]  ;;  %v885_v48 = vld [vmem:[#allocation2 + $0x2b0] sm:$0xff] }
 0x72b   :  { %1265 = vmatpush.msra.mxu2 %v859_v52  ;;  %1288 = vmatpush.msra.mxu3 %v987_v53  ;;  %v1013_v49 = vld [vmem:[#allocation2 + $0x6b0] sm:$0xff]  ;;  %v886_v50 = vld [vmem:[#allocation2 + $0x2b8] sm:$0xff] }
 0x72c   :  { %1311 = vmatpush.msra.mxu0 %v860_v56  ;;  %1334 = vmatpush.msra.mxu1 %v988_v57  ;;  %v1014_v51 = vld [vmem:[#allocation2 + $0x6b8] sm:$0xff]  ;;  %v877_v52 = vld [vmem:[#allocation2 + $0x270] sm:$0xff] }
 0x72d   :  { %1181 = vmatmul.f32.vlgmr.msrb.gmra.mxu2 %v2757_v10  ;;  %1204 = vmatmul.f32.vlgmr.msrb.gmra.mxu3 %v2759_v11  ;;  %v1005_v53 = vld [vmem:[#allocation2 + $0x670] sm:$0xff]  ;;  %v878_v56 = vld [vmem:[#allocation2 + $0x278] sm:$0xff] }
 0x72e   :  { %1227 = vmatmul.f32.vlgmr.msrb.gmra.mxu0 %v2757_v10  ;;  %1250 = vmatmul.f32.vlgmr.msrb.gmra.mxu1 %v2759_v11  ;;  %v1006_v57 = vld [vmem:[#allocation2 + $0x678] sm:$0xff] }
 0x72f   :  { %1266 = vmatpush.msra.mxu2 %v851_v58  ;;  %1289 = vmatpush.msra.mxu3 %v979_v20  ;;  %v869_v58 = vld [vmem:[#allocation2 + $0x230] sm:$0xff] }
 0x730   :  { %1312 = vmatpush.msra.mxu0 %v852_v59  ;;  %1335 = vmatpush.msra.mxu1 %v980_v60  ;;  %v997_v20 = vld [vmem:[#allocation2 + $0x630] sm:$0xff]  ;;  %v870_v59 = vld [vmem:[#allocation2 + $0x238] sm:$0xff] }
 0x731   :  { %1267 = vmatpush.msra.mxu2 %v843_v61  ;;  %1290 = vmatpush.msra.mxu3 %v971_v62  ;;  %v998_v60 = vld [vmem:[#allocation2 + $0x638] sm:$0xff]  ;;  %v861_v61 = vld [vmem:[#allocation2 + $0x1f0] sm:$0xff] }
 0x732   :  { %1313 = vmatpush.msra.mxu0 %v844_v63  ;;  %1336 = vmatpush.msra.mxu1 %v972_v2  ;;  %v989_v62 = vld [vmem:[#allocation2 + $0x5f0] sm:$0xff]  ;;  %v862_v63 = vld [vmem:[#allocation2 + $0x1f8] sm:$0xff] }
 0x733   :  { %1268 = vmatpush.msra.mxu2 %v835_v7  ;;  %1291 = vmatpush.msra.mxu3 %v963_v23  ;;  %v990_v2 = vld [vmem:[#allocation2 + $0x5f8] sm:$0xff]  ;;  %v853_v7 = vld [vmem:[#allocation2 + $0x1b0] sm:$0xff] }
 0x734   :  { %1314 = vmatpush.msra.mxu0 %v836_v24  ;;  %1337 = vmatpush.msra.mxu1 %v964_v8  ;;  %v981_v23 = vld [vmem:[#allocation2 + $0x5b0] sm:$0xff]  ;;  %v854_v24 = vld [vmem:[#allocation2 + $0x1b8] sm:$0xff] }
 0x735   :  { %1269 = vmatpush.msra.mxu2 %v827_v9  ;;  %1292 = vmatpush.msra.mxu3 %v955_v0  ;;  %v982_v8 = vld [vmem:[#allocation2 + $0x5b8] sm:$0xff]  ;;  %v845_v9 = vld [vmem:[#allocation2 + $0x170] sm:$0xff] }
 0x736   :  { %1315 = vmatpush.msra.mxu0 %v828_v1  ;;  %1338 = vmatpush.msra.mxu1 %v956_v14  ;;  %v973_v0 = vld [vmem:[#allocation2 + $0x570] sm:$0xff]  ;;  %v846_v1 = vld [vmem:[#allocation2 + $0x178] sm:$0xff] }
 0x737   :  { %1184 = vmatmul.f32.gmra.mxu2 %v2767_v37  ;;  %1207 = vmatmul.f32.gmra.mxu3 %v2769_v38  ;;  %v974_v14 = vld [vmem:[#allocation2 + $0x578] sm:$0xff] }
 0x738   :  { %1230 = vmatmul.f32.gmra.mxu0 %v2767_v37  ;;  %1253 = vmatmul.f32.gmra.mxu1 %v2769_v38 }
 0x739   :  { %1270 = vmatpush.msra.mxu2 %v819_v15  ;;  %1293 = vmatpush.msra.mxu3 %v947_v54  ;;  %v837_v15 = vld [vmem:[#allocation2 + $0x130] sm:$0xff] }
 0x73a   :  { %1316 = vmatpush.msra.mxu0 %v820_v55  ;;  %1339 = vmatpush.msra.mxu1 %v948_v16  ;;  %v965_v54 = vld [vmem:[#allocation2 + $0x530] sm:$0xff]  ;;  %v838_v55 = vld [vmem:[#allocation2 + $0x138] sm:$0xff] }
 0x73b   :  { %1271 = vmatpush.msra.mxu2 %v811_v17  ;;  %1294 = vmatpush.msra.mxu3 %v939_v3  ;;  %v966_v16 = vld [vmem:[#allocation2 + $0x538] sm:$0xff]  ;;  %v829_v17 = vld [vmem:[#allocation2 + $0xf0] sm:$0xff] }
 0x73c   :  { %1317 = vmatpush.msra.mxu0 %v812_v18  ;;  %1340 = vmatpush.msra.mxu1 %v940_v4  ;;  %v957_v3 = vld [vmem:[#allocation2 + $0x4f0] sm:$0xff]  ;;  %v830_v18 = vld [vmem:[#allocation2 + $0xf8] sm:$0xff] }
 0x73d   :  { %1272 = vmatpush.msra.mxu2 %v803_v19  ;;  %1295 = vmatpush.msra.mxu3 %v931_v21  ;;  %v958_v4 = vld [vmem:[#allocation2 + $0x4f8] sm:$0xff]  ;;  %v821_v19 = vld [vmem:[#allocation2 + $0xb0] sm:$0xff] }
 0x73e   :  { %1318 = vmatpush.msra.mxu0 %v804_v22  ;;  %1341 = vmatpush.msra.mxu1 %v932_v26  ;;  %v949_v21 = vld [vmem:[#allocation2 + $0x4b0] sm:$0xff]  ;;  %v822_v22 = vld [vmem:[#allocation2 + $0xb8] sm:$0xff] }
 0x73f   :  { %1349 = vmatpush.msrb.mxu2 %v925_v27  ;;  %1372 = vmatpush.msrb.mxu3 %v1053_v28  ;;  %v950_v26 = vld [vmem:[#allocation2 + $0x4b8] sm:$0xff]  ;;  %v813_v27 = vld [vmem:[#allocation2 + $0x70] sm:$0xff] }
 0x740   :  { %1395 = vmatpush.msrb.mxu0 %v926_v29  ;;  %1418 = vmatpush.msrb.mxu1 %v1054_v32  ;;  %v941_v28 = vld [vmem:[#allocation2 + $0x470] sm:$0xff]  ;;  %v814_v29 = vld [vmem:[#allocation2 + $0x78] sm:$0xff] }
 0x741   :  { %1350 = vmatpush.msrb.mxu2 %v917_v34  ;;  %1373 = vmatpush.msrb.mxu3 %v1045_v35  ;;  %v942_v32 = vld [vmem:[#allocation2 + $0x478] sm:$0xff]  ;;  %v805_v34 = vld [vmem:[#allocation2 + $0x30] sm:$0xff] }
 0x742   :  { %1396 = vmatpush.msrb.mxu0 %v918_v36  ;;  %1419 = vmatpush.msrb.mxu1 %v1046_v30  ;;  %v933_v35 = vld [vmem:[#allocation2 + $0x430] sm:$0xff]  ;;  %v806_v36 = vld [vmem:[#allocation2 + $0x38] sm:$0xff] }
 0x743   :  { %1273 = vmatmul.f32.vlgmr.msra.gmra.mxu2 %v2757_v10  ;;  %1296 = vmatmul.f32.vlgmr.msra.gmra.mxu3 %v2759_v11  ;;  %v934_v30 = vld [vmem:[#allocation2 + $0x438] sm:$0xff] }
 0x744   :  { %1319 = vmatmul.f32.vlgmr.msra.gmra.mxu0 %v2757_v10  ;;  %1342 = vmatmul.f32.vlgmr.msra.gmra.mxu1 %v2759_v11 }
 0x745   :  { %1351 = vmatpush.msrb.mxu2 %v909_v31  ;;  %1374 = vmatpush.msrb.mxu3 %v1037_v25  ;;  %v1519_v31 = vld [vmem:[#allocation5 + $0x1f0] sm:$0xff] }
 0x746   :  { %1397 = vmatpush.msrb.mxu0 %v910_v39  ;;  %1420 = vmatpush.msrb.mxu1 %v1038_v33  ;;  %v1487_v25 = vld [vmem:[#allocation5 + $0xf0] sm:$0xff]  ;;  %v1517_v33 = vld [vmem:[#allocation5 + $0x1e0] sm:$0xff] }
 0x747   :  { %1352 = vmatpush.msrb.mxu2 %v901_v40  ;;  %1375 = vmatpush.msrb.mxu3 %v1029_v41  ;;  %v1583_v39 = vld [vmem:[#allocation5 + $0x3f0] sm:$0xff]  ;;  %v1485_v40 = vld [vmem:[#allocation5 + $0xe0] sm:$0xff] }
 0x748   :  { %1398 = vmatpush.msrb.mxu0 %v902_v42  ;;  %1421 = vmatpush.msrb.mxu1 %v1030_v43  ;;  %v1581_v41 = vld [vmem:[#allocation5 + $0x3e0] sm:$0xff]  ;;  %v1515_v42 = vld [vmem:[#allocation5 + $0x1d0] sm:$0xff] }
 0x749   :  { %1353 = vmatpush.msrb.mxu2 %v893_v44  ;;  %1376 = vmatpush.msrb.mxu3 %v1021_v45  ;;  %v1483_v43 = vld [vmem:[#allocation5 + $0xd0] sm:$0xff] }
 0x74a   :  { %1399 = vmatpush.msrb.mxu0 %v894_v46  ;;  %1422 = vmatpush.msrb.mxu1 %v1022_v47  ;;  %v1579_v44 = vld [vmem:[#allocation5 + $0x3d0] sm:$0xff]  ;;  %v1513_v46 = vld [vmem:[#allocation5 + $0x1c0] sm:$0xff] }
 0x74b   :  { %1354 = vmatpush.msrb.mxu2 %v885_v48  ;;  %1377 = vmatpush.msrb.mxu3 %v1013_v49  ;;  %v1551_v45 = vld [vmem:[#allocation5 + $0x2f0] sm:$0xff]  ;;  %v1481_v47 = vld [vmem:[#allocation5 + $0xc0] sm:$0xff] }
 0x74c   :  { %1400 = vmatpush.msrb.mxu0 %v886_v50  ;;  %1423 = vmatpush.msrb.mxu1 %v1014_v51  ;;  %v1511_v48 = vld [vmem:[#allocation5 + $0x1b0] sm:$0xff] }
 0x74d   :  { %1276 = vmatmul.f32.gmra.mxu2 %v2767_v37  ;;  %1299 = vmatmul.f32.gmra.mxu3 %v2769_v38  ;;  %v1479_v49 = vld [vmem:[#allocation5 + $0xb0] sm:$0xff] }
 0x74e   :  { %1322 = vmatmul.f32.gmra.mxu0 %v2767_v37  ;;  %1345 = vmatmul.f32.gmra.mxu1 %v2769_v38  ;;  %v1575_v50 = vld [vmem:[#allocation5 + $0x3b0] sm:$0xff] }
 0x74f   :  { %1355 = vmatpush.msrb.mxu2 %v877_v52  ;;  %1378 = vmatpush.msrb.mxu3 %v1005_v53  ;;  %v1547_v51 = vld [vmem:[#allocation5 + $0x2d0] sm:$0xff]  ;;  %v1509_v52 = vld [vmem:[#allocation5 + $0x1a0] sm:$0xff] }
 0x750   :  { %1401 = vmatpush.msrb.mxu0 %v878_v56  ;;  %1424 = vmatpush.msrb.mxu1 %v1006_v57  ;;  %v1477_v53 = vld [vmem:[#allocation5 + $0xa0] sm:$0xff] }
 0x751   :  { %1356 = vmatpush.msrb.mxu2 %v869_v58  ;;  %1379 = vmatpush.msrb.mxu3 %v997_v20  ;;  %v1573_v56 = vld [vmem:[#allocation5 + $0x3a0] sm:$0xff]  ;;  %v1507_v58 = vld [vmem:[#allocation5 + $0x190] sm:$0xff] }
 0x752   :  { %1402 = vmatpush.msrb.mxu0 %v870_v59  ;;  %1425 = vmatpush.msrb.mxu1 %v998_v60  ;;  %v1545_v57 = vld [vmem:[#allocation5 + $0x2c0] sm:$0xff]  ;;  %v1475_v20 = vld [vmem:[#allocation5 + $0x90] sm:$0xff] }
 0x753   :  { %1357 = vmatpush.msrb.mxu2 %v861_v61  ;;  %1380 = vmatpush.msrb.mxu3 %v989_v62  ;;  %v1505_v59 = vld [vmem:[#allocation5 + $0x180] sm:$0xff] }
 0x754   :  { %1403 = vmatpush.msrb.mxu0 %v862_v63  ;;  %1426 = vmatpush.msrb.mxu1 %v990_v2  ;;  %v1473_v60 = vld [vmem:[#allocation5 + $0x80] sm:$0xff]  ;;  %v1503_v63 = vld [vmem:[#allocation5 + $0x170] sm:$0xff] }
 0x755   :  { %1358 = vmatpush.msrb.mxu2 %v853_v7  ;;  %1381 = vmatpush.msrb.mxu3 %v981_v23  ;;  %v1569_v61 = vld [vmem:[#allocation5 + $0x380] sm:$0xff]  ;;  %v1471_v2 = vld [vmem:[#allocation5 + $0x70] sm:$0xff] }
 0x756   :  { %1404 = vmatpush.msrb.mxu0 %v854_v24  ;;  %1427 = vmatpush.msrb.mxu1 %v982_v8  ;;  %v1541_v62 = vld [vmem:[#allocation5 + $0x2a0] sm:$0xff]  ;;  %v1567_v7 = vld [vmem:[#allocation5 + $0x370] sm:$0xff] }
 0x757   :  { %1359 = vmatpush.msrb.mxu2 %v845_v9  ;;  %1382 = vmatpush.msrb.mxu3 %v973_v0  ;;  %v1539_v23 = vld [vmem:[#allocation5 + $0x290] sm:$0xff]  ;;  %v1501_v24 = vld [vmem:[#allocation5 + $0x160] sm:$0xff] }
 0x758   :  { %1405 = vmatpush.msrb.mxu0 %v846_v1  ;;  %1428 = vmatpush.msrb.mxu1 %v974_v14  ;;  %v1469_v8 = vld [vmem:[#allocation5 + $0x60] sm:$0xff]  ;;  %v1499_v1 = vld [vmem:[#allocation5 + $0x150] sm:$0xff] }
 0x759   :  { %1360 = vmatpush.msrb.mxu2 %v837_v15  ;;  %1383 = vmatpush.msrb.mxu3 %v965_v54  ;;  %v1565_v9 = vld [vmem:[#allocation5 + $0x360] sm:$0xff]  ;;  %v1467_v14 = vld [vmem:[#allocation5 + $0x50] sm:$0xff] }
 0x75a   :  { %1406 = vmatpush.msrb.mxu0 %v838_v55  ;;  %1429 = vmatpush.msrb.mxu1 %v966_v16  ;;  %v1537_v0 = vld [vmem:[#allocation5 + $0x280] sm:$0xff]  ;;  %v1563_v15 = vld [vmem:[#allocation5 + $0x350] sm:$0xff] }
 0x75b   :  { %1361 = vmatpush.msrb.mxu2 %v829_v17  ;;  %1384 = vmatpush.msrb.mxu3 %v957_v3  ;;  %v1535_v54 = vld [vmem:[#allocation5 + $0x270] sm:$0xff]  ;;  %v1497_v55 = vld [vmem:[#allocation5 + $0x140] sm:$0xff] }
 0x75c   :  { %1407 = vmatpush.msrb.mxu0 %v830_v18  ;;  %1430 = vmatpush.msrb.mxu1 %v958_v4  ;;  %v1465_v16 = vld [vmem:[#allocation5 + $0x40] sm:$0xff]  ;;  %v1495_v18 = vld [vmem:[#allocation5 + $0x130] sm:$0xff] }
 0x75d   :  { %1362 = vmatpush.msrb.mxu2 %v821_v19  ;;  %1385 = vmatpush.msrb.mxu3 %v949_v21  ;;  %v1561_v17 = vld [vmem:[#allocation5 + $0x340] sm:$0xff]  ;;  %v1463_v4 = vld [vmem:[#allocation5 + $0x30] sm:$0xff] }
 0x75e   :  { %1408 = vmatpush.msrb.mxu0 %v822_v22  ;;  %1431 = vmatpush.msrb.mxu1 %v950_v26  ;;  %v1533_v3 = vld [vmem:[#allocation5 + $0x260] sm:$0xff]  ;;  %v1559_v19 = vld [vmem:[#allocation5 + $0x330] sm:$0xff] }
 0x75f   :  { %1363 = vmatpush.msrb.mxu2 %v813_v27  ;;  %1386 = vmatpush.msrb.mxu3 %v941_v28  ;;  %v1531_v21 = vld [vmem:[#allocation5 + $0x250] sm:$0xff]  ;;  %v1493_v22 = vld [vmem:[#allocation5 + $0x120] sm:$0xff] }
 0x760   :  { %1409 = vmatpush.msrb.mxu0 %v814_v29  ;;  %1432 = vmatpush.msrb.mxu1 %v942_v32  ;;  %v1461_v26 = vld [vmem:[#allocation5 + $0x20] sm:$0xff]  ;;  %v1491_v29 = vld [vmem:[#allocation5 + $0x110] sm:$0xff] }
 0x761   :  { %1364 = vmatpush.msrb.mxu2 %v805_v34  ;;  %1387 = vmatpush.msrb.mxu3 %v933_v35  ;;  %v1557_v27 = vld [vmem:[#allocation5 + $0x320] sm:$0xff]  ;;  %v1459_v32 = vld [vmem:[#allocation5 + $0x10] sm:$0xff] }
 0x762   :  { %1410 = vmatpush.msrb.mxu0 %v806_v36  ;;  %1433 = vmatpush.msrb.mxu1 %v934_v30  ;;  %v1529_v28 = vld [vmem:[#allocation5 + $0x240] sm:$0xff]  ;;  %v1555_v34 = vld [vmem:[#allocation5 + $0x310] sm:$0xff] }
 0x763   :  { %1365 = vmatmul.f32.vlgmr.msrb.gmra.mxu2 %v2757_v10  ;;  %1388 = vmatmul.f32.vlgmr.msrb.gmra.mxu3 %v2759_v11  ;;  %v1527_v35 = vld [vmem:[#allocation5 + $0x230] sm:$0xff]  ;;  %v1489_v36 = vld [vmem:[#allocation5 + $0x100] sm:$0xff] }
 0x764   :  { %1411 = vmatmul.f32.vlgmr.msrb.gmra.mxu0 %v2757_v10  ;;  %1434 = vmatmul.f32.vlgmr.msrb.gmra.mxu1 %v2759_v11  ;;  %v1577_v10 = vld [vmem:[#allocation5 + $0x3c0] sm:$0xff] }
 0x765   :  { %1742 = vmatpush.msra.mxu3 %v1519_v31  ;;  %1719 = vmatpush.msra.mxu2 %v1487_v25  ;;  %v1549_v11 = vld [vmem:[#allocation5 + $0x2e0] sm:$0xff]  ;;  %v1647_v31 = vld [vmem:[#allocation5 + $0x5f0] sm:$0xff] }
 0x766   :  { %1788 = vmatpush.msra.mxu1 %v1583_v39  ;;  %1765 = vmatpush.msra.mxu0 %v1551_v45  ;;  %v1457_v30 = vld [vmem:[#allocation5] sm:$0xff]  ;;  %v1615_v25 = vld [vmem:[#allocation5 + $0x4f0] sm:$0xff] }
 0x767   :  { %1743 = vmatpush.msra.mxu3 %v1517_v33  ;;  %1720 = vmatpush.msra.mxu2 %v1485_v40  ;;  %v1553_v39 = vld [vmem:[#allocation5 + $0x300] sm:$0xff]  ;;  %v1523_v45 = vld [vmem:[#allocation5 + $0x210] sm:$0xff] }
 0x768   :  { %1789 = vmatpush.msra.mxu1 %v1581_v41  ;;  %1766 = vmatpush.msra.mxu0 %v1549_v11  ;;  %v1525_v33 = vld [vmem:[#allocation5 + $0x220] sm:$0xff] }
 0x769   :  { %1744 = vmatpush.msra.mxu3 %v1515_v42  ;;  %1721 = vmatpush.msra.mxu2 %v1483_v43  ;;  %v1645_v40 = vld [vmem:[#allocation5 + $0x5e0] sm:$0xff]  ;;  %v1711_v42 = vld [vmem:[#allocation5 + $0x7f0] sm:$0xff] }
 0x76a   :  { %1790 = vmatpush.msra.mxu1 %v1579_v44  ;;  %1767 = vmatpush.msra.mxu0 %v1547_v51  ;;  %v1613_v41 = vld [vmem:[#allocation5 + $0x4e0] sm:$0xff]  ;;  %v1643_v43 = vld [vmem:[#allocation5 + $0x5d0] sm:$0xff] }
 0x76b   :  { %1368 = vmatmul.f32.gmra.mxu2 %v2767_v37  ;;  %1391 = vmatmul.f32.gmra.mxu3 %v2769_v38  ;;  %v1611_v44 = vld [vmem:[#allocation5 + $0x4d0] sm:$0xff]  ;;  %v1609_v11 = vld [vmem:[#allocation5 + $0x4c0] sm:$0xff] }
 0x76c   :  { %1414 = vmatmul.f32.gmra.mxu0 %v2767_v37  ;;  %1437 = vmatmul.f32.gmra.mxu1 %v2769_v38  ;;  %v1571_v37 = vld [vmem:[#allocation5 + $0x390] sm:$0xff] }
 0x76d   :  { %1745 = vmatpush.msra.mxu3 %v1513_v46  ;;  %1722 = vmatpush.msra.mxu2 %v1481_v47  ;;  %v1543_v38 = vld [vmem:[#allocation5 + $0x2b0] sm:$0xff]  ;;  %v1709_v46 = vld [vmem:[#allocation5 + $0x7e0] sm:$0xff] }
 0x76e   :  { %1791 = vmatpush.msra.mxu1 %v1577_v10  ;;  %1768 = vmatpush.msra.mxu0 %v1545_v57  ;;  %v1521_v47 = vld [vmem:[#allocation5 + $0x200] sm:$0xff]  ;;  %v1607_v51 = vld [vmem:[#allocation5 + $0x4b0] sm:$0xff] }
 0x76f   :  { %1746 = vmatpush.msra.mxu3 %v1511_v48  ;;  %1723 = vmatpush.msra.mxu2 %v1479_v49  ;;  %v1641_v10 = vld [vmem:[#allocation5 + $0x5c0] sm:$0xff]  ;;  %v1707_v48 = vld [vmem:[#allocation5 + $0x7d0] sm:$0xff] }
 0x770   :  { %1792 = vmatpush.msra.mxu1 %v1575_v50  ;;  %1769 = vmatpush.msra.mxu0 %v1543_v38  ;;  %v1679_v49 = vld [vmem:[#allocation5 + $0x6f0] sm:$0xff]  ;;  %v1605_v57 = vld [vmem:[#allocation5 + $0x4a0] sm:$0xff] }
 0x771   :  { %1747 = vmatpush.msra.mxu3 %v1509_v52  ;;  %1724 = vmatpush.msra.mxu2 %v1477_v53  ;;  %v1639_v50 = vld [vmem:[#allocation5 + $0x5b0] sm:$0xff]  ;;  %v1705_v52 = vld [vmem:[#allocation5 + $0x7c0] sm:$0xff] }
 0x772   :  { %1793 = vmatpush.msra.mxu1 %v1573_v56  ;;  %1770 = vmatpush.msra.mxu0 %v1541_v62  ;;  %v1677_v53 = vld [vmem:[#allocation5 + $0x6e0] sm:$0xff] }
 0x773   :  { %1748 = vmatpush.msra.mxu3 %v1507_v58  ;;  %1725 = vmatpush.msra.mxu2 %v1475_v20  ;;  %v1637_v56 = vld [vmem:[#allocation5 + $0x5a0] sm:$0xff]  ;;  %v1703_v58 = vld [vmem:[#allocation5 + $0x7b0] sm:$0xff] }
 0x774   :  { %1794 = vmatpush.msra.mxu1 %v1571_v37  ;;  %1771 = vmatpush.msra.mxu0 %v1539_v23  ;;  %v1635_v20 = vld [vmem:[#allocation5 + $0x590] sm:$0xff]  ;;  %v2802_v38 = vld [vmem:[%s2948_s10] sm:$0xff] }
 0x775   :  { %1749 = vmatpush.msra.mxu3 %v1505_v59  ;;  %1726 = vmatpush.msra.mxu2 %v1473_v60  ;;  %v1603_v37 = vld [vmem:[#allocation5 + $0x490] sm:$0xff]  ;;  %v1701_v60 = vld [vmem:[#allocation5 + $0x7a0] sm:$0xff] }
 0x776   :  { %1795 = vmatpush.msra.mxu1 %v1569_v61  ;;  %1772 = vmatpush.msra.mxu0 %v1537_v0  ;;  %v1675_v59 = vld [vmem:[#allocation5 + $0x6d0] sm:$0xff]  ;;  %v1633_v61 = vld [vmem:[#allocation5 + $0x580] sm:$0xff] }
 0x777   :  { %1750 = vmatpush.msra.mxu3 %v1503_v63  ;;  %1727 = vmatpush.msra.mxu2 %v1471_v2  ;;  %v1601_v62 = vld [vmem:[#allocation5 + $0x480] sm:$0xff]  ;;  %v1058_v2 = vperm.slane %v2802_v38, 1  ;;  %v1671_v23 = vld [vmem:[#allocation5 + $0x6b0] sm:$0xff] }
 0x778   :  { %1796 = vmatpush.msra.mxu1 %v1567_v7  ;;  %1773 = vmatpush.msra.mxu0 %v1535_v54  ;;  %v1673_v63 = vld [vmem:[#allocation5 + $0x6c0] sm:$0xff]  ;;  %v1699_v7 = vld [vmem:[#allocation5 + $0x790] sm:$0xff] }
 0x779   :  { %1751 = vmatpush.msra.mxu3 %v1501_v24  ;;  %1728 = vmatpush.msra.mxu2 %v1469_v8  ;;  %v1631_v24 = vld [vmem:[#allocation5 + $0x570] sm:$0xff]  ;;  %v1629_v0 = vld [vmem:[#allocation5 + $0x560] sm:$0xff] }
 0x77a   :  { %1797 = vmatpush.msra.mxu1 %v1565_v9  ;;  %1774 = vmatpush.msra.mxu0 %v1533_v3  ;;  %v1599_v8 = vld [vmem:[#allocation5 + $0x470] sm:$0xff]  ;;  %v1697_v9 = vld [vmem:[#allocation5 + $0x780] sm:$0xff]  ;;  %v1057_v3 = vperm.slane %v2802_v38, 0 }
 0x77b   :  { %1752 = vmatpush.msra.mxu3 %v1499_v1  ;;  %1729 = vmatpush.msra.mxu2 %v1467_v14  ;;  %v1597_v14 = vld [vmem:[#allocation5 + $0x460] sm:$0xff] }
 0x77c   :  { %1798 = vmatpush.msra.mxu1 %v1563_v15  ;;  %1775 = vmatpush.msra.mxu0 %v1531_v21  ;;  %v1669_v15 = vld [vmem:[#allocation5 + $0x6a0] sm:$0xff] }
 0x77d   :  { %1753 = vmatpush.msra.mxu3 %v1497_v55  ;;  %1730 = vmatpush.msra.mxu2 %v1465_v16  ;;  %v1695_v55 = vld [vmem:[#allocation5 + $0x770] sm:$0xff]  ;;  %v1593_v21 = vld [vmem:[#allocation5 + $0x440] sm:$0xff] }
 0x77e   :  { %1799 = vmatpush.msra.mxu1 %v1561_v17  ;;  %1776 = vmatpush.msra.mxu0 %v1529_v28  ;;  %v1627_v17 = vld [vmem:[#allocation5 + $0x550] sm:$0xff]  ;;  %v1693_v28 = vld [vmem:[#allocation5 + $0x760] sm:$0xff] }
 0x77f   :  { %1754 = vmatpush.msra.mxu3 %v1495_v18  ;;  %1731 = vmatpush.msra.mxu2 %v1463_v4  ;;  %v1595_v18 = vld [vmem:[#allocation5 + $0x450] sm:$0xff] }
 0x780   :  { %1800 = vmatpush.msra.mxu1 %v1559_v19  ;;  %1777 = vmatpush.msra.mxu0 %v1527_v35  ;;  %v1625_v19 = vld [vmem:[#allocation5 + $0x540] sm:$0xff] }
 0x781   :  { %1755 = vmatpush.msra.mxu3 %v1493_v22  ;;  %1732 = vmatpush.msra.mxu2 %v1461_v26  ;;  %v1665_v35 = vld [vmem:[#allocation5 + $0x680] sm:$0xff] }
 0x782   :  { %1801 = vmatpush.msra.mxu1 %v1557_v27  ;;  %1778 = vmatpush.msra.mxu0 %v1525_v33  ;;  %v1667_v27 = vld [vmem:[#allocation5 + $0x690] sm:$0xff]  ;;  %v1589_v33 = vld [vmem:[#allocation5 + $0x420] sm:$0xff] }
 0x783   :  { %1756 = vmatpush.msra.mxu3 %v1491_v29  ;;  %1733 = vmatpush.msra.mxu2 %v1459_v32  ;;  %v1623_v29 = vld [vmem:[#allocation5 + $0x530] sm:$0xff] }
 0x784   :  { %1802 = vmatpush.msra.mxu1 %v1555_v34  ;;  %1779 = vmatpush.msra.mxu0 %v1523_v45  ;;  %v1591_v34 = vld [vmem:[#allocation5 + $0x430] sm:$0xff] }
 0x785   :  { %1757 = vmatpush.msra.mxu3 %v1489_v36  ;;  %1734 = vmatpush.msra.mxu2 %v1457_v30  ;;  %v1691_v30 = vld [vmem:[#allocation5 + $0x750] sm:$0xff] }
 0x786   :  { %1803 = vmatpush.msra.mxu1 %v1553_v39  ;;  %1780 = vmatpush.msra.mxu0 %v1521_v47  ;;  %v1621_v39 = vld [vmem:[#allocation5 + $0x520] sm:$0xff]  ;;  %v1687_v45 = vld [vmem:[#allocation5 + $0x730] sm:$0xff] }
 0x787   :  { %1834 = vmatpush.msrb.mxu3 %v1647_v31  ;;  %1811 = vmatpush.msrb.mxu2 %v1615_v25  ;;  %v1663_v31 = vld [vmem:[#allocation5 + $0x670] sm:$0xff]  ;;  %v1617_v47 = vld [vmem:[#allocation5 + $0x500] sm:$0xff] }
 0x788   :  { %1880 = vmatpush.msrb.mxu1 %v1711_v42  ;;  %1857 = vmatpush.msrb.mxu0 %v1679_v49  ;;  %v1619_v42 = vld [vmem:[#allocation5 + $0x510] sm:$0xff]  ;;  %v1488_v49 = vld [vmem:[#allocation5 + $0xf8] sm:$0xff] }
 0x789   :  { %1835 = vmatpush.msrb.mxu3 %v1645_v40  ;;  %1812 = vmatpush.msrb.mxu2 %v1613_v41  ;;  %v1689_v40 = vld [vmem:[#allocation5 + $0x740] sm:$0xff] }
 0x78a   :  { %1881 = vmatpush.msrb.mxu1 %v1709_v46  ;;  %1858 = vmatpush.msrb.mxu0 %v1677_v53  ;;  %v1486_v53 = vld [vmem:[#allocation5 + $0xe8] sm:$0xff] }
 0x78b   :  { %1836 = vmatpush.msrb.mxu3 %v1643_v43  ;;  %1813 = vmatpush.msrb.mxu2 %v1611_v44  ;;  %v1587_v43 = vld [vmem:[#allocation5 + $0x410] sm:$0xff]  ;;  %v1661_v44 = vld [vmem:[#allocation5 + $0x660] sm:$0xff] }
 0x78c   :  { %1882 = vmatpush.msrb.mxu1 %v1707_v48  ;;  %1859 = vmatpush.msrb.mxu0 %v1675_v59  ;;  %v1520_v48 = vld [vmem:[#allocation5 + $0x1f8] sm:$0xff] }
 0x78d   :  { %1837 = vmatpush.msrb.mxu3 %v1641_v10  ;;  %1814 = vmatpush.msrb.mxu2 %v1609_v11  ;;  %v1585_v10 = vld [vmem:[#allocation5 + $0x400] sm:$0xff]  ;;  %v1484_v59 = vld [vmem:[#allocation5 + $0xd8] sm:$0xff] }
 0x78e   :  { %1883 = vmatpush.msrb.mxu1 %v1705_v52  ;;  %1860 = vmatpush.msrb.mxu0 %v1673_v63  ;;  %v1655_v63 = vld [vmem:[#allocation5 + $0x630] sm:$0xff] }
 0x78f   :  { %1838 = vmatpush.msrb.mxu3 %v1639_v50  ;;  %1815 = vmatpush.msrb.mxu2 %v1607_v51  ;;  %v1518_v51 = vld [vmem:[#allocation5 + $0x1e8] sm:$0xff] }
 0x790   :  { %1884 = vmatpush.msrb.mxu1 %v1703_v58  ;;  %1861 = vmatpush.msrb.mxu0 %v1671_v23  ;;  %v1060_v23 = vperm.slane %v2802_v38, 3 }
 0x791   :  { %1839 = vmatpush.msrb.mxu3 %v1637_v56  ;;  %1816 = vmatpush.msrb.mxu2 %v1605_v57  ;;  %v1659_v56 = vld [vmem:[#allocation5 + $0x650] sm:$0xff]  ;;  %v1685_v57 = vld [vmem:[#allocation5 + $0x720] sm:$0xff] }
 0x792   :  { %1885 = vmatpush.msrb.mxu1 %v1701_v60  ;;  %1862 = vmatpush.msrb.mxu0 %v1669_v15  ;;  %v1657_v60 = vld [vmem:[#allocation5 + $0x640] sm:$0xff] }
 0x793   :  { %1840 = vmatpush.msrb.mxu3 %v1635_v20  ;;  %1817 = vmatpush.msrb.mxu2 %v1603_v37  ;;  %v1516_v20 = vld [vmem:[#allocation5 + $0x1d8] sm:$0xff] }
 0x794   :  { %1886 = vmatpush.msrb.mxu1 %v1699_v7  ;;  %1863 = vmatpush.msrb.mxu0 %v1667_v27  ;;  %v1514_v7 = vld [vmem:[#allocation5 + $0x1c8] sm:$0xff]  ;;  %v1649_v27 = vld [vmem:[#allocation5 + $0x600] sm:$0xff] }
 0x795   :  { %1841 = vmatpush.msrb.mxu3 %v1633_v61  ;;  %1818 = vmatpush.msrb.mxu2 %v1601_v62  ;;  %v1136_v1 = vpop.f32.mrf.mxu0  ;;  %v1159_v16 = vpop.f32.mrf.mxu1  ;;  %v1683_v62 = vld [vmem:[#allocation5 + $0x710] sm:$0xff] }
 0x796   :  { %v1137_v54 = vadd.f32 %v1136_v1, %v1058_v2  ;;  %1887 = vmatpush.msrb.mxu1 %v1697_v9  ;;  %1864 = vmatpush.msrb.mxu0 %v1665_v35  ;;  %v1681_v9 = vld [vmem:[#allocation5 + $0x700] sm:$0xff]  ;;  %v1584_v35 = vld [vmem:[#allocation5 + $0x3f8] sm:$0xff] }
 0x797   :  { %1842 = vmatpush.msrb.mxu3 %v1631_v24  ;;  %1819 = vmatpush.msrb.mxu2 %v1599_v8  ;;  %v1482_v24 = vld [vmem:[#allocation5 + $0xc8] sm:$0xff]  ;;  %v1653_v1 = vld [vmem:[#allocation5 + $0x620] sm:$0xff] }
 0x798   :  { %v2808_v4 = vadd.f32 %v1159_v16, %v1137_v54  ;;  %1888 = vmatpush.msrb.mxu1 %v1695_v55  ;;  %1865 = vmatpush.msrb.mxu0 %v1663_v31  ;;  %v1480_v54 = vld [vmem:[#allocation5 + $0xb8] sm:$0xff]  ;;  %v1510_v16 = vld [vmem:[#allocation5 + $0x1a8] sm:$0xff] }
 0x799   :  { %1843 = vmatpush.msrb.mxu3 %v1629_v0  ;;  %1820 = vmatpush.msrb.mxu2 %v1597_v14  ;;  %v1512_v0 = vld [vmem:[#allocation5 + $0x1b8] sm:$0xff] }
 0x79a   :  { %v1442_v22 = vmax.f32 %v2808_v4, 0.0  ;;  %v1090_v26 = vpop.f32.mrf.mxu2  ;;  %1889 = vmatpush.msrb.mxu1 %v1693_v28  ;;  %v1113_v36 = vpop.f32.mrf.mxu3  ;;  %1866 = vmatpush.msrb.mxu0 %v1661_v44  ;;  %v1476_v28 = vld [vmem:[#allocation5 + $0x98] sm:$0xff] }
 0x79b   :  { %1844 = vmatpush.msrb.mxu3 %v1627_v17  ;;  %1821 = vmatpush.msrb.mxu2 %v1595_v18  ;;  %v1091_v32 = vadd.f32 %v1090_v26, %v1057_v3  ;;  %v1651_v17 = vld [vmem:[#allocation5 + $0x610] sm:$0xff]  ;;  %v1059_v18 = vperm.slane %v2802_v38, 2  ;;  %v1508_v26 = vld [vmem:[#allocation5 + $0x198] sm:$0xff] }
 0x79c   :  { %1758 = vmatmul.f32.vlgmr.msra.gmra.mxu3 %v1442_v22  ;;  %1890 = vmatpush.msrb.mxu1 %v1691_v30  ;;  %v1474_v30 = vld [vmem:[#allocation5 + $0x88] sm:$0xff]  ;;  %v1596_v4 = vld [vmem:[#allocation5 + $0x458] sm:$0xff] }
 0x79d   :  { %1845 = vmatpush.msrb.mxu3 %v1625_v19  ;;  %1822 = vmatpush.msrb.mxu2 %v1593_v21  ;;  %v2813_v25 = vadd.f32 %v1113_v36, %v1091_v32  ;;  %v1478_v19 = vld [vmem:[#allocation5 + $0xa8] sm:$0xff] }
 0x79e   :  { %1891 = vmatpush.msrb.mxu1 %v1689_v40  ;;  %1867 = vmatpush.msrb.mxu0 %v1659_v56  ;;  %v1498_v56 = vld [vmem:[#allocation5 + $0x148] sm:$0xff] }
 0x79f   :  { %1846 = vmatpush.msrb.mxu3 %v1623_v29  ;;  %1823 = vmatpush.msrb.mxu2 %v1591_v34  ;;  %v1441_v41 = vmax.f32 %v2813_v25, 0.0  ;;  %v1506_v34 = vld [vmem:[#allocation5 + $0x188] sm:$0xff] }
 0x7a0   :  { %1892 = vmatpush.msrb.mxu1 %v1687_v45  ;;  %1868 = vmatpush.msrb.mxu0 %v1657_v60  ;;  %v1496_v60 = vld [vmem:[#allocation5 + $0x138] sm:$0xff] }
 0x7a1   :  { %1847 = vmatpush.msrb.mxu3 %v1621_v39  ;;  %1824 = vmatpush.msrb.mxu2 %v1589_v33  ;;  %v1139_v46 = vpop.f32.mrf.mxu0  ;;  %v1162_v50 = vpop.f32.mrf.mxu1  ;;  %v1504_v39 = vld [vmem:[#allocation5 + $0x178] sm:$0xff]  ;;  %v1582_v33 = vld [vmem:[#allocation5 + $0x3e8] sm:$0xff] }
 0x7a2   :  { %1735 = vmatmul.f32.vlgmr.msra.gmra.mxu2 %v1441_v41  ;;  %v1140_v11 = vadd.f32 %v1139_v46, %v1058_v2  ;;  %1893 = vmatpush.msrb.mxu1 %v1685_v57  ;;  %v1470_v46 = vld [vmem:[#allocation5 + $0x68] sm:$0xff] }
 0x7a3   :  { %1848 = vmatpush.msrb.mxu3 %v1619_v42  ;;  %1825 = vmatpush.msrb.mxu2 %v1587_v43  ;;  %v1472_v42 = vld [vmem:[#allocation5 + $0x78] sm:$0xff]  ;;  %v1502_v43 = vld [vmem:[#allocation5 + $0x168] sm:$0xff] }
 0x7a4   :  { %v2822_v52 = vadd.f32 %v1162_v50, %v1140_v11  ;;  %1894 = vmatpush.msrb.mxu1 %v1683_v62  ;;  %1869 = vmatpush.msrb.mxu0 %v1655_v63  ;;  %v1500_v11 = vld [vmem:[#allocation5 + $0x158] sm:$0xff]  ;;  %v1550_v57 = vld [vmem:[#allocation5 + $0x2e8] sm:$0xff] }
 0x7a5   :  { %1849 = vmatpush.msrb.mxu3 %v1617_v47  ;;  %1826 = vmatpush.msrb.mxu2 %v1585_v10  ;;  %v1580_v47 = vld [vmem:[#allocation5 + $0x3d8] sm:$0xff] }
 0x7a6   :  { %v1450_v58 = vmax.f32 %v2822_v52, 0.0  ;;  %v1093_v37 = vpop.f32.mrf.mxu2  ;;  %v1116_v2 = vpop.f32.mrf.mxu3  ;;  %1895 = vmatpush.msrb.mxu1 %v1681_v9  ;;  %1870 = vmatpush.msrb.mxu0 %v1653_v1  ;;  %v1468_v50 = vld [vmem:[#allocation5 + $0x58] sm:$0xff]  ;;  %v1546_v1 = vld [vmem:[#allocation5 + $0x2c8] sm:$0xff] }
 0x7a7   :  { %1926 = vmatpush.msra.mxu3 %v1520_v48  ;;  %1903 = vmatpush.msra.mxu2 %v1488_v49  ;;  %v1094_v61 = vadd.f32 %v1093_v37, %v1057_v3  ;;  %v1552_v48 = vld [vmem:[#allocation5 + $0x2f8] sm:$0xff] }
 0x7a8   :  { %1761 = vmatmul.f32.gmra.mxu3 %v1450_v58  ;;  %1871 = vmatpush.msrb.mxu0 %v1651_v17  ;;  %v1464_v63 = vld [vmem:[#allocation5 + $0x38] sm:$0xff] }
 0x7a9   :  { %1927 = vmatpush.msra.mxu3 %v1518_v51  ;;  %1904 = vmatpush.msra.mxu2 %v1486_v53  ;;  %v2830_v8 = vadd.f32 %v1116_v2, %v1094_v61  ;;  %v1578_v51 = vld [vmem:[#allocation5 + $0x3c8] sm:$0xff]  ;;  %v1576_v61 = vld [vmem:[#allocation5 + $0x3b8] sm:$0xff] }
 0x7aa   :  { %1872 = vmatpush.msrb.mxu0 %v1649_v27  ;;  %v1548_v2 = vld [vmem:[#allocation5 + $0x2d8] sm:$0xff]  ;;  %v1570_v27 = vld [vmem:[#allocation5 + $0x388] sm:$0xff] }
 0x7ab   :  { %1928 = vmatpush.msra.mxu3 %v1516_v20  ;;  %1905 = vmatpush.msra.mxu2 %v1484_v59  ;;  %v1449_v14 = vmax.f32 %v2830_v8, 0.0  ;;  %v1228_v15 = vpop.f32.mrf.mxu0  ;;  %v1251_v3 = vpop.f32.mrf.mxu1  ;;  %v1466_v20 = vld [vmem:[#allocation5 + $0x48] sm:$0xff]  ;;  %v1572_v17 = vld [vmem:[#allocation5 + $0x398] sm:$0xff] }
 0x7ac   :  { %v1229_v55 = vadd.f32 %v1228_v15, %v1060_v23  ;;  %v1062_v15 = vperm.slane %v2802_v38, 5 }
 0x7ad   :  { %1929 = vmatpush.msra.mxu3 %v1514_v7  ;;  %1906 = vmatpush.msra.mxu2 %v1482_v24  ;;  %v1574_v24 = vld [vmem:[#allocation5 + $0x3a8] sm:$0xff] }
 0x7ae   :  { %1738 = vmatmul.f32.gmra.mxu2 %v1449_v14  ;;  %v2836_v21 = vadd.f32 %v1251_v3, %v1229_v55  ;;  %v1490_v3 = vld [vmem:[#allocation5 + $0x108] sm:$0xff] }
 0x7af   :  { %1930 = vmatpush.msra.mxu3 %v1512_v0  ;;  %1907 = vmatpush.msra.mxu2 %v1480_v54  ;;  %v1462_v0 = vld [vmem:[#allocation5 + $0x28] sm:$0xff]  ;;  %v1492_v54 = vld [vmem:[#allocation5 + $0x118] sm:$0xff] }
 0x7b0   :  { %v1444_v29 = vmax.f32 %v2836_v21, 0.0  ;;  %v1182_v32 = vpop.f32.mrf.mxu2  ;;  %v1205_v31 = vpop.f32.mrf.mxu3  ;;  %v1660_v21 = vld [vmem:[#allocation5 + $0x658] sm:$0xff] }
 0x7b1   :  { %1931 = vmatpush.msra.mxu3 %v1510_v16  ;;  %1908 = vmatpush.msra.mxu2 %v1478_v19  ;;  %v1183_v36 = vadd.f32 %v1182_v32, %v1059_v18  ;;  %v1460_v16 = vld [vmem:[#allocation5 + $0x18] sm:$0xff]  ;;  %v1542_v32 = vld [vmem:[#allocation5 + $0x2a8] sm:$0xff] }
 0x7b2   :  { %1804 = vmatmul.f32.vlgmr.msra.gmra.mxu1 %v1444_v29 }
 0x7b3   :  { %1932 = vmatpush.msra.mxu3 %v1508_v26  ;;  %1909 = vmatpush.msra.mxu2 %v1476_v28  ;;  %v2841_v40 = vadd.f32 %v1205_v31, %v1183_v36  ;;  %v1458_v26 = vld [vmem:[#allocation5 + $0x8] sm:$0xff]  ;;  %v1568_v36 = vld [vmem:[#allocation5 + $0x378] sm:$0xff] }
 0x7b4   :  { %1972 = vmatpush.msra.mxu1 %v1584_v35  ;;  %v1061_v35 = vperm.slane %v2802_v38, 4  ;;  %v1540_v31 = vld [vmem:[#allocation5 + $0x298] sm:$0xff] }
 0x7b5   :  { %1933 = vmatpush.msra.mxu3 %v1506_v34  ;;  %1910 = vmatpush.msra.mxu2 %v1474_v30  ;;  %v1443_v44 = vmax.f32 %v2841_v40, 0.0  ;;  %v1231_v45 = vpop.f32.mrf.mxu0  ;;  %v1254_v49 = vpop.f32.mrf.mxu1  ;;  %v1654_v40 = vld [vmem:[#allocation5 + $0x628] sm:$0xff] }
 0x7b6   :  { %1973 = vmatpush.msra.mxu1 %v1582_v33  ;;  %v1232_v10 = vadd.f32 %v1231_v45, %v1060_v23  ;;  %v1494_v23 = vld [vmem:[#allocation5 + $0x128] sm:$0xff] }
 0x7b7   :  { %1934 = vmatpush.msra.mxu3 %v1504_v39  ;;  %1911 = vmatpush.msra.mxu2 %v1472_v42  ;;  %v1566_v39 = vld [vmem:[#allocation5 + $0x368] sm:$0xff] }
 0x7b8   :  { %1781 = vmatmul.f32.vlgmr.msra.gmra.mxu0 %v1443_v44  ;;  %v2846_v53 = vadd.f32 %v1254_v49, %v1232_v10  ;;  %1974 = vmatpush.msra.mxu1 %v1580_v47  ;;  %v1538_v45 = vld [vmem:[#allocation5 + $0x288] sm:$0xff]  ;;  %v1564_v47 = vld [vmem:[#allocation5 + $0x358] sm:$0xff] }
 0x7b9   :  { %1935 = vmatpush.msra.mxu3 %v1502_v43  ;;  %1912 = vmatpush.msra.mxu2 %v1470_v46  ;;  %v1648_v43 = vld [vmem:[#allocation5 + $0x5f8] sm:$0xff] }
 0x7ba   :  { %1949 = vmatpush.msra.mxu0 %v1552_v48  ;;  %v1452_v37 = vmax.f32 %v2846_v53, 0.0  ;;  %v1185_v59 = vpop.f32.mrf.mxu2  ;;  %1975 = vmatpush.msra.mxu1 %v1578_v51  ;;  %v1208_v7 = vpop.f32.mrf.mxu3  ;;  %v1536_v48 = vld [vmem:[#allocation5 + $0x278] sm:$0xff]  ;;  %v1650_v53 = vld [vmem:[#allocation5 + $0x608] sm:$0xff] }
 0x7bb   :  { %1936 = vmatpush.msra.mxu3 %v1500_v11  ;;  %1913 = vmatpush.msra.mxu2 %v1468_v50  ;;  %v1186_v62 = vadd.f32 %v1185_v59, %v1059_v18  ;;  %v1544_v18 = vld [vmem:[#allocation5 + $0x2b8] sm:$0xff]  ;;  %v1646_v11 = vld [vmem:[#allocation5 + $0x5e8] sm:$0xff] }
 0x7bc   :  { %1950 = vmatpush.msra.mxu0 %v1550_v57  ;;  %1807 = vmatmul.f32.gmra.mxu1 %v1452_v37  ;;  %v1562_v50 = vld [vmem:[#allocation5 + $0x348] sm:$0xff]  ;;  %v1644_v51 = vld [vmem:[#allocation5 + $0x5d8] sm:$0xff] }
 0x7bd   :  { %1937 = vmatpush.msra.mxu3 %v1498_v56  ;;  %1914 = vmatpush.msra.mxu2 %v1466_v20  ;;  %v2851_v9 = vadd.f32 %v1208_v7, %v1186_v62  ;;  %v1616_v20 = vld [vmem:[#allocation5 + $0x4f8] sm:$0xff]  ;;  %v1534_v59 = vld [vmem:[#allocation5 + $0x268] sm:$0xff] }
 0x7be   :  { %1976 = vmatpush.msra.mxu1 %v1576_v61  ;;  %1951 = vmatpush.msra.mxu0 %v1548_v2  ;;  %v1642_v61 = vld [vmem:[#allocation5 + $0x5c8] sm:$0xff]  ;;  %v1560_v62 = vld [vmem:[#allocation5 + $0x338] sm:$0xff] }
 0x7bf   :  { %1938 = vmatpush.msra.mxu3 %v1496_v60  ;;  %1915 = vmatpush.msra.mxu2 %v1464_v63  ;;  %v1451_v55 = vmax.f32 %v2851_v9, 0.0  ;;  %v1614_v2 = vld [vmem:[#allocation5 + $0x4e8] sm:$0xff]  ;;  %v1532_v7 = vld [vmem:[#allocation5 + $0x258] sm:$0xff] }
 0x7c0   :  { %1977 = vmatpush.msra.mxu1 %v1574_v24  ;;  %1952 = vmatpush.msra.mxu0 %v1546_v1  ;;  %v1640_v24 = vld [vmem:[#allocation5 + $0x5b8] sm:$0xff] }
 0x7c1   :  { %1939 = vmatpush.msra.mxu3 %v1494_v23  ;;  %1916 = vmatpush.msra.mxu2 %v1462_v0  ;;  %v1320_v19 = vpop.f32.mrf.mxu0  ;;  %v1343_v34 = vpop.f32.mrf.mxu1  ;;  %v1558_v0 = vld [vmem:[#allocation5 + $0x328] sm:$0xff]  ;;  %v1612_v1 = vld [vmem:[#allocation5 + $0x4d8] sm:$0xff] }
 0x7c2   :  { %1784 = vmatmul.f32.gmra.mxu0 %v1451_v55  ;;  %v1321_v28 = vadd.f32 %v1320_v19, %v1062_v15  ;;  %1978 = vmatpush.msra.mxu1 %v1572_v17  ;;  %v1530_v17 = vld [vmem:[#allocation5 + $0x248] sm:$0xff]  ;;  %v1556_v19 = vld [vmem:[#allocation5 + $0x318] sm:$0xff] }
 0x7c3   :  { %1940 = vmatpush.msra.mxu3 %v1492_v54  ;;  %1917 = vmatpush.msra.mxu2 %v1460_v16  ;;  %v1638_v16 = vld [vmem:[#allocation5 + $0x5a8] sm:$0xff] }
 0x7c4   :  { %1953 = vmatpush.msra.mxu0 %v1544_v18  ;;  %v2858_v30 = vadd.f32 %v1343_v34, %v1321_v28  ;;  %1979 = vmatpush.msra.mxu1 %v1570_v27  ;;  %v1610_v18 = vld [vmem:[#allocation5 + $0x4c8] sm:$0xff]  ;;  %v1636_v27 = vld [vmem:[#allocation5 + $0x598] sm:$0xff] }
 0x7c5   :  { %1941 = vmatpush.msra.mxu3 %v1490_v3  ;;  %1918 = vmatpush.msra.mxu2 %v1458_v26  ;;  %v1528_v28 = vld [vmem:[#allocation5 + $0x238] sm:$0xff] }
 0x7c6   :  { %1954 = vmatpush.msra.mxu0 %v1542_v32  ;;  %v1446_v33 = vmax.f32 %v2858_v30, 0.0  ;;  %v1274_v42 = vpop.f32.mrf.mxu2  ;;  %1980 = vmatpush.msra.mxu1 %v1568_v36  ;;  %v1297_v10 = vpop.f32.mrf.mxu3  ;;  %v1608_v34 = vld [vmem:[#allocation5 + $0x4b8] sm:$0xff]  ;;  %v1554_v36 = vld [vmem:[#allocation5 + $0x308] sm:$0xff] }
 0x7c7   :  { %v1275_v46 = vadd.f32 %v1274_v42, %v1061_v35  ;;  %v1526_v42 = vld [vmem:[#allocation5 + $0x228] sm:$0xff] }
 0x7c8   :  { %1955 = vmatpush.msra.mxu0 %v1540_v31  ;;  %1850 = vmatmul.f32.vlgmr.msrb.gmra.mxu3 %v1446_v33  ;;  %v1634_v31 = vld [vmem:[#allocation5 + $0x588] sm:$0xff] }
 0x7c9   :  { %1981 = vmatpush.msra.mxu1 %v1566_v39  ;;  %v2863_v49 = vadd.f32 %v1297_v10, %v1275_v46  ;;  %2018 = vmatpush.msrb.mxu3 %v1648_v43  ;;  %v1606_v39 = vld [vmem:[#allocation5 + $0x4a8] sm:$0xff]  ;;  %v1632_v43 = vld [vmem:[#allocation5 + $0x578] sm:$0xff] }
 0x7ca   :  { %1956 = vmatpush.msra.mxu0 %v1538_v45  ;;  %v1604_v45 = vld [vmem:[#allocation5 + $0x498] sm:$0xff]  ;;  %v1630_v46 = vld [vmem:[#allocation5 + $0x568] sm:$0xff] }
 0x7cb   :  { %1982 = vmatpush.msra.mxu1 %v1564_v47  ;;  %v1445_v56 = vmax.f32 %v2863_v49, 0.0  ;;  %v1323_v57 = vpop.f32.mrf.mxu0  ;;  %2019 = vmatpush.msrb.mxu3 %v1646_v11  ;;  %v1346_v63 = vpop.f32.mrf.mxu1  ;;  %v1524_v47 = vld [vmem:[#allocation5 + $0x218] sm:$0xff]  ;;  %v1602_v10 = vld [vmem:[#allocation5 + $0x488] sm:$0xff] }
 0x7cc   :  { %1957 = vmatpush.msra.mxu0 %v1536_v48  ;;  %v1324_v60 = vadd.f32 %v1323_v57, %v1062_v15  ;;  %v1628_v11 = vld [vmem:[#allocation5 + $0x558] sm:$0xff]  ;;  %v1522_v48 = vld [vmem:[#allocation5 + $0x208] sm:$0xff] }
 0x7cd   :  { %1983 = vmatpush.msra.mxu1 %v1562_v50  ;;  %2020 = vmatpush.msrb.mxu3 %v1644_v51  ;;  %v1600_v50 = vld [vmem:[#allocation5 + $0x478] sm:$0xff]  ;;  %v1626_v51 = vld [vmem:[#allocation5 + $0x548] sm:$0xff] }
 0x7ce   :  { %1827 = vmatmul.f32.vlgmr.msrb.gmra.mxu2 %v1445_v56  ;;  %v2868_v23 = vadd.f32 %v1346_v63, %v1324_v60  ;;  %1958 = vmatpush.msra.mxu0 %v1534_v59  ;;  %v1598_v57 = vld [vmem:[#allocation5 + $0x468] sm:$0xff]  ;;  %v1624_v59 = vld [vmem:[#allocation5 + $0x538] sm:$0xff] }
 0x7cf   :  { %1995 = vmatpush.msrb.mxu2 %v1616_v20  ;;  %2021 = vmatpush.msrb.mxu3 %v1642_v61  ;;  %v1064_v20 = vperm.slane %v2802_v38, 7  ;;  %v1698_v49 = vld [vmem:[#allocation5 + $0x788] sm:$0xff] }
 0x7d0   :  { %1984 = vmatpush.msra.mxu1 %v1560_v62  ;;  %v1454_v15 = vmax.f32 %v2868_v23, 0.0  ;;  %v1277_v54 = vpop.f32.mrf.mxu2  ;;  %1959 = vmatpush.msra.mxu0 %v1532_v7  ;;  %v1300_v26 = vpop.f32.mrf.mxu3  ;;  %v1594_v62 = vld [vmem:[#allocation5 + $0x448] sm:$0xff]  ;;  %v1063_v7 = vperm.slane %v2802_v38, 6  ;;  %v1588_v38 = vld [vmem:[#allocation5 + $0x418] sm:$0xff] }
 0x7d1   :  { %1996 = vmatpush.msrb.mxu2 %v1614_v2  ;;  %v1278_v3 = vadd.f32 %v1277_v54, %v1061_v35  ;;  %2022 = vmatpush.msrb.mxu3 %v1640_v24  ;;  %v1620_v2 = vld [vmem:[#allocation5 + $0x518] sm:$0xff]  ;;  %v1694_v23 = vld [vmem:[#allocation5 + $0x768] sm:$0xff] }
 0x7d2   :  { %1985 = vmatpush.msra.mxu1 %v1558_v0  ;;  %1853 = vmatmul.f32.gmra.mxu3 %v1454_v15  ;;  %v1592_v24 = vld [vmem:[#allocation5 + $0x438] sm:$0xff]  ;;  %v1590_v0 = vld [vmem:[#allocation5 + $0x428] sm:$0xff] }
 0x7d3   :  { %1997 = vmatpush.msrb.mxu2 %v1612_v1  ;;  %v2873_v32 = vadd.f32 %v1300_v26, %v1278_v3  ;;  %2023 = vmatpush.msrb.mxu3 %v1638_v16 }
 0x7d4   :  { %1960 = vmatpush.msra.mxu0 %v1530_v17  ;;  %1986 = vmatpush.msra.mxu1 %v1556_v19  ;;  %v1712_v17 = vld [vmem:[#allocation5 + $0x7f8] sm:$0xff]  ;;  %v1586_v19 = vld [vmem:[#allocation5 + $0x408] sm:$0xff] }
 0x7d5   :  { %1998 = vmatpush.msrb.mxu2 %v1610_v18  ;;  %v1453_v35 = vmax.f32 %v2873_v32, 0.0  ;;  %2024 = vmatpush.msrb.mxu3 %v1636_v27  ;;  %v1708_v27 = vld [vmem:[#allocation5 + $0x7d8] sm:$0xff]  ;;  %v1662_v32 = vld [vmem:[#allocation5 + $0x668] sm:$0xff] }
 0x7d6   :  { %1961 = vmatpush.msra.mxu0 %v1528_v28  ;;  %1987 = vmatpush.msra.mxu1 %v1554_v36  ;;  %v1680_v28 = vld [vmem:[#allocation5 + $0x6f8] sm:$0xff]  ;;  %v1706_v36 = vld [vmem:[#allocation5 + $0x7c8] sm:$0xff] }
 0x7d7   :  { %1999 = vmatpush.msrb.mxu2 %v1608_v34  ;;  %2025 = vmatpush.msrb.mxu3 %v1634_v31  ;;  %v1678_v31 = vld [vmem:[#allocation5 + $0x6e8] sm:$0xff] }
 0x7d8   :  { %1830 = vmatmul.f32.gmra.mxu2 %v1453_v35  ;;  %1962 = vmatpush.msra.mxu0 %v1526_v42 }
 0x7d9   :  { %2000 = vmatpush.msrb.mxu2 %v1606_v39  ;;  %2026 = vmatpush.msrb.mxu3 %v1632_v43  ;;  %v1676_v43 = vld [vmem:[#allocation5 + $0x6d8] sm:$0xff] }
 0x7da   :  { %1942 = vmatmul.f32.vlgmr.msra.gmra.mxu3 %v1442_v22  ;;  %1963 = vmatpush.msra.mxu0 %v1524_v47  ;;  %v1622_v22 = vld [vmem:[#allocation5 + $0x528] sm:$0xff] }
 0x7db   :  { %2001 = vmatpush.msrb.mxu2 %v1604_v45  ;;  %2027 = vmatpush.msrb.mxu3 %v1630_v46  ;;  %v1702_v46 = vld [vmem:[#allocation5 + $0x7a8] sm:$0xff] }
 0x7dc   :  { %1964 = vmatpush.msra.mxu0 %v1522_v48 }
 0x7dd   :  { %2002 = vmatpush.msrb.mxu2 %v1602_v10  ;;  %2028 = vmatpush.msrb.mxu3 %v1628_v11  ;;  %v1674_v10 = vld [vmem:[#allocation5 + $0x6c8] sm:$0xff]  ;;  %v1700_v11 = vld [vmem:[#allocation5 + $0x798] sm:$0xff] }
 0x7df   :  { %2003 = vmatpush.msrb.mxu2 %v1600_v50  ;;  %2029 = vmatpush.msrb.mxu3 %v1626_v51  ;;  %v1672_v50 = vld [vmem:[#allocation5 + $0x6b8] sm:$0xff] }
 0x7e0   :  { %1919 = vmatmul.f32.vlgmr.msra.gmra.mxu2 %v1441_v41  ;;  %v1618_v41 = vld [vmem:[#allocation5 + $0x508] sm:$0xff]  ;;  %v1696_v51 = vld [vmem:[#allocation5 + $0x778] sm:$0xff] }
 0x7e1   :  { %2004 = vmatpush.msrb.mxu2 %v1598_v57  ;;  %v1412_v60 = vpop.f32.mrf.mxu0  ;;  %v1435_v61 = vpop.f32.mrf.mxu1  ;;  %2030 = vmatpush.msrb.mxu3 %v1624_v59  ;;  %v1668_v57 = vld [vmem:[#allocation5 + $0x698] sm:$0xff] }
 0x7e2   :  { %v1413_v63 = vadd.f32 %v1412_v60, %v1064_v20  ;;  %1945 = vmatmul.f32.gmra.mxu3 %v1450_v58  ;;  %v1710_v58 = vld [vmem:[#allocation5 + $0x7e8] sm:$0xff]  ;;  %v1664_v59 = vld [vmem:[#allocation5 + $0x678] sm:$0xff] }
 0x7e3   :  { %2005 = vmatpush.msrb.mxu2 %v1596_v4  ;;  %2031 = vmatpush.msrb.mxu3 %v1622_v22  ;;  %v1690_v4 = vld [vmem:[#allocation5 + $0x748] sm:$0xff]  ;;  %v1684_v60 = vld [vmem:[#allocation5 + $0x718] sm:$0xff] }
 0x7e4   :  { %v2886_v25 = vadd.f32 %v1435_v61, %v1413_v63  ;;  %v1658_v22 = vld [vmem:[#allocation5 + $0x648] sm:$0xff]  ;;  %v1656_v61 = vld [vmem:[#allocation5 + $0x638] sm:$0xff] }
 0x7e5   :  { %2006 = vmatpush.msrb.mxu2 %v1594_v62  ;;  %2032 = vmatpush.msrb.mxu3 %v1620_v2  ;;  %v1682_v62 = vld [vmem:[#allocation5 + $0x708] sm:$0xff] }
 0x7e6   :  { %v1448_v1 = vmax.f32 %v2886_v25, 0.0  ;;  %v1366_v54 = vpop.f32.mrf.mxu2  ;;  %v1389_v16 = vpop.f32.mrf.mxu3 }
 0x7e7   :  { %2007 = vmatpush.msrb.mxu2 %v1592_v24  ;;  %v1367_v52 = vadd.f32 %v1366_v54, %v1063_v7  ;;  %2033 = vmatpush.msrb.mxu3 %v1618_v41 }
 0x7e8   :  { %1922 = vmatmul.f32.gmra.mxu2 %v1449_v14  ;;  %1896 = vmatmul.f32.vlgmr.msrb.gmra.mxu1 %v1448_v1 }
 0x7e9   :  { %2008 = vmatpush.msrb.mxu2 %v1590_v0  ;;  %v2893_v3 = vadd.f32 %v1389_v16, %v1367_v52  ;;  %v1415_v18 = vpop.f32.mrf.mxu0  ;;  %2064 = vmatpush.msrb.mxu1 %v1712_v17  ;;  %v1438_v14 = vpop.f32.mrf.mxu1 }
 0x7ea   :  { %v1416_v26 = vadd.f32 %v1415_v18, %v1064_v20  ;;  %2034 = vmatmul.f32.vlgmr.msrb.gmra.mxu3 %v1446_v33  ;;  %v1704_v33 = vld [vmem:[#allocation5 + $0x7b8] sm:$0xff] }
 0x7eb   :  { %2009 = vmatpush.msrb.mxu2 %v1588_v38  ;;  %v1447_v8 = vmax.f32 %v2893_v3, 0.0  ;;  %2065 = vmatpush.msrb.mxu1 %v1710_v58  ;;  %v1692_v20 = vld [vmem:[#allocation5 + $0x758] sm:$0xff] }
 0x7ec   :  { %v2898_v34 = vadd.f32 %v1438_v14, %v1416_v26 }
 0x7ed   :  { %2010 = vmatpush.msrb.mxu2 %v1586_v19  ;;  %2066 = vmatpush.msrb.mxu1 %v1708_v27 }
 0x7ee   :  { %1873 = vmatmul.f32.vlgmr.msrb.gmra.mxu0 %v1447_v8  ;;  %v1456_v39 = vmax.f32 %v2898_v34, 0.0  ;;  %v1369_v30 = vpop.f32.mrf.mxu2  ;;  %v1392_v45 = vpop.f32.mrf.mxu3 }
 0x7ef   :  { %2041 = vmatpush.msrb.mxu0 %v1680_v28  ;;  %v1370_v42 = vadd.f32 %v1369_v30, %v1063_v7  ;;  %2067 = vmatpush.msrb.mxu1 %v1706_v36 }
 0x7f0   :  { %2011 = vmatmul.f32.vlgmr.msrb.gmra.mxu2 %v1445_v56  ;;  %1899 = vmatmul.f32.gmra.mxu1 %v1456_v39  ;;  %v1670_v56 = vld [vmem:[#allocation5 + $0x6a8] sm:$0xff] }
 0x7f1   :  { %2042 = vmatpush.msrb.mxu0 %v1678_v31  ;;  %v1393_v47 = vadd.f32 %v1392_v45, %v1370_v42  ;;  %2068 = vmatpush.msrb.mxu1 %v1704_v33 }
 0x7f2   :  { %2037 = vmatmul.f32.gmra.mxu3 %v1454_v15  ;;  %v1666_v15 = vld [vmem:[#allocation5 + $0x688] sm:$0xff] }
 0x7f3   :  { %2043 = vmatpush.msrb.mxu0 %v1676_v43  ;;  %v1455_v48 = vmax.f32 %v1393_v47, 0.0  ;;  %2069 = vmatpush.msrb.mxu1 %v1702_v46 }
 0x7f5   :  { %2044 = vmatpush.msrb.mxu0 %v1674_v10  ;;  %2070 = vmatpush.msrb.mxu1 %v1700_v11 }
 0x7f6   :  { %1876 = vmatmul.f32.gmra.mxu0 %v1455_v48 }
 0x7f7   :  { %2045 = vmatpush.msrb.mxu0 %v1672_v50  ;;  %2071 = vmatpush.msrb.mxu1 %v1698_v49 }
 0x7f8   :  { %2014 = vmatmul.f32.gmra.mxu2 %v1453_v35  ;;  %1988 = vmatmul.f32.vlgmr.msra.gmra.mxu1 %v1444_v29  ;;  %v1688_v35 = vld [vmem:[#allocation5 + $0x738] sm:$0xff]  ;;  %v1686_v29 = vld [vmem:[#allocation5 + $0x728] sm:$0xff] }
 0x7f9   :  { %2046 = vmatpush.msrb.mxu0 %v1670_v56  ;;  %2072 = vmatpush.msrb.mxu1 %v1696_v51 }
 0x7fb   :  { %2047 = vmatpush.msrb.mxu0 %v1668_v57  ;;  %2073 = vmatpush.msrb.mxu1 %v1694_v23 }
 0x7fd   :  { %2048 = vmatpush.msrb.mxu0 %v1666_v15  ;;  %2074 = vmatpush.msrb.mxu1 %v1692_v20 }
 0x7fe   :  { %1965 = vmatmul.f32.vlgmr.msra.gmra.mxu0 %v1443_v44  ;;  %v1652_v44 = vld [vmem:[#allocation5 + $0x618] sm:$0xff] }
 0x7ff   :  { %2049 = vmatpush.msrb.mxu0 %v1664_v59  ;;  %2075 = vmatpush.msrb.mxu1 %v1690_v4 }
 0x800   :  { %1991 = vmatmul.f32.gmra.mxu1 %v1452_v37 }
 0x801   :  { %2050 = vmatpush.msrb.mxu0 %v1662_v32  ;;  %2076 = vmatpush.msrb.mxu1 %v1688_v35 }
 0x803   :  { %2051 = vmatpush.msrb.mxu0 %v1660_v21  ;;  %2077 = vmatpush.msrb.mxu1 %v1686_v29 }
 0x805   :  { %2052 = vmatpush.msrb.mxu0 %v1658_v22  ;;  %2078 = vmatpush.msrb.mxu1 %v1684_v60 }
 0x806   :  { %1968 = vmatmul.f32.gmra.mxu0 %v1451_v55  ;;  %v1713_v55 = vld [vmem:[%s2950_s12] sm:$0x3]  ;;  %s2258_s12 = smov [#allocation7]  }
 0x807   :  { %2053 = vmatpush.msrb.mxu0 %v1656_v61  ;;  %2079 = vmatpush.msrb.mxu1 %v1682_v62  ;;  %v1715_v7 = vperm.slane %v1713_v55, 0  ;;  %v1716_v47 = vperm.slane %v1713_v55, 1  ;;  %s2099_s3 = sshll.u32 %s2258_s12, 4  ;;  %s2100_s3 = int_to_ptr.vmem [resolvable:$true] %s2099_s3 }
 0x808   :  { %2080 = vmatmul.f32.vlgmr.msrb.gmra.mxu1 %v1448_v1 }
 0x809   :  { %2054 = vmatpush.msrb.mxu0 %v1654_v40 }
 0x80b   :  { %2055 = vmatpush.msrb.mxu0 %v1652_v44 }
 0x80d   :  { %2056 = vmatpush.msrb.mxu0 %v1650_v53 }
 0x80e   :  { %2057 = vmatmul.f32.vlgmr.msrb.gmra.mxu0 %v1447_v8 }
 0x810   :  { %2083 = vmatmul.f32.gmra.mxu1 %v1456_v39 }
 0x816   :  { %2060 = vmatmul.f32.gmra.mxu0 %v1455_v48 }
 0x81f   :  { %v1759_v9 = vpop.f32.mrf.mxu3 }
 0x825   :  { %v1736_v37 = vpop.f32.mrf.mxu2 }
 0x826   :  { %v1737_v41 = vadd.f32 %v1736_v37, %v1715_v7 }
 0x828   :  { %v1760_v1 = vadd.f32 %v1759_v9, %v1737_v41 }
 0x82b   :  { %v1762_v24 = vpop.f32.mrf.mxu3 }
 0x82f   :  { %v1805_v2 = vpop.f32.mrf.mxu1 }
 0x831   :  { %v1739_v63 = vpop.f32.mrf.mxu2 }
 0x832   :  { %v1740_v52 = vadd.f32 %v1739_v63, %v1715_v7 }
 0x834   :  { %v1763_v18 = vadd.f32 %v1762_v24, %v1740_v52 }
 0x835   :  { %v1782_v25 = vpop.f32.mrf.mxu0 }
 0x836   :  { %v1783_v17 = vadd.f32 %v1782_v25, %v1760_v1 }
 0x838   :  { %v1806_v58 = vadd.f32 %v1805_v2, %v1783_v17 }
 0x839   :  { %v1808_v54 = vpop.f32.mrf.mxu1 }
 0x83f   :  { %v1785_v38 = vpop.f32.mrf.mxu0 }
 0x840   :  { %v1786_v27 = vadd.f32 %v1785_v38, %v1763_v18 }
 0x842   :  { %v1809_v34 = vadd.f32 %v1808_v54, %v1786_v27 }
 0x84b   :  { %v1851_v16 = vpop.f32.mrf.mxu3 }
 0x851   :  { %v1828_v0 = vpop.f32.mrf.mxu2 }
 0x852   :  { %v1829_v19 = vadd.f32 %v1828_v0, %v1806_v58 }
 0x854   :  { %v1852_v14 = vadd.f32 %v1851_v16, %v1829_v19 }
 0x855   :  { %v1854_v8 = vpop.f32.mrf.mxu3 }
 0x85b   :  { %v1831_v3 = vpop.f32.mrf.mxu2 }
 0x85c   :  { %v1832_v31 = vadd.f32 %v1831_v3, %v1809_v34 }
 0x85d   :  { %v1943_v45 = vpop.f32.mrf.mxu3 }
 0x85e   :  { %v1855_v43 = vadd.f32 %v1854_v8, %v1832_v31 }
 0x863   :  { %v1920_v33 = vpop.f32.mrf.mxu2 }
 0x864   :  { %v1921_v50 = vadd.f32 %v1920_v33, %v1716_v47 }
 0x865   :  { %v1897_v26 = vpop.f32.mrf.mxu1  ;;  %v1946_v23 = vpop.f32.mrf.mxu3 }
 0x866   :  { %v1944_v57 = vadd.f32 %v1943_v45, %v1921_v50 }
 0x86b   :  { %v1874_v28 = vpop.f32.mrf.mxu0  ;;  %v1923_v56 = vpop.f32.mrf.mxu2 }
 0x86c   :  { %v1875_v36 = vadd.f32 %v1874_v28, %v1852_v14  ;;  %v1924_v20 = vadd.f32 %v1923_v56, %v1716_v47 }
 0x86d   :  { %v1900_v30 = vpop.f32.mrf.mxu1  ;;  %v2035_v22 = vpop.f32.mrf.mxu3 }
 0x86e   :  { %v1898_v39 = vadd.f32 %v1897_v26, %v1875_v36  ;;  %v1947_v35 = vadd.f32 %v1946_v23, %v1924_v20 }
 0x870   :  { %v2087_v42 = vadd.f32 %v1898_v39, %v2706_v5 }
 0x872   :  { %2091 = vst [vmem:[#allocation7] sm:$0xff] %v2087_v42 }
 0x873   :  { %v1877_v46 = vpop.f32.mrf.mxu0  ;;  %v2012_v4 = vpop.f32.mrf.mxu2 }
 0x874   :  { %v1878_v10 = vadd.f32 %v1877_v46, %v1855_v43 }
 0x875   :  { %v1989_v48 = vpop.f32.mrf.mxu1  ;;  %v2038_v55 = vpop.f32.mrf.mxu3 }
 0x876   :  { %v1901_v11 = vadd.f32 %v1900_v30, %v1878_v10 }
 0x878   :  { %v2089_v49 = vadd.f32 %v1901_v11, %v2714_v12 }
 0x87a   :  { %2093 = vst [vmem:[#allocation7 + $0x10] sm:$0xff] %v2089_v49 }
 0x87b   :  { %v1966_v51 = vpop.f32.mrf.mxu0  ;;  %v2015_v44 = vpop.f32.mrf.mxu2 }
 0x87c   :  { %v1967_v15 = vadd.f32 %v1966_v51, %v1944_v57 }
 0x87d   :  { %v1992_v59 = vpop.f32.mrf.mxu1 }
 0x87e   :  { %v1990_v5 = vadd.f32 %v1989_v48, %v1967_v15 }
 0x880   :  { %v2013_v29 = vadd.f32 %v2012_v4, %v1990_v5 }
 0x882   :  { %v2036_v61 = vadd.f32 %v2035_v22, %v2013_v29 }
 0x883   :  { %v1969_v32 = vpop.f32.mrf.mxu0 }
 0x884   :  { %v1970_v21 = vadd.f32 %v1969_v32, %v1947_v35 }
 0x885   :  { %v2081_v62 = vpop.f32.mrf.mxu1 }
 0x886   :  { %v1993_v60 = vadd.f32 %v1992_v59, %v1970_v21 }
 0x888   :  { %v2016_v37 = vadd.f32 %v2015_v44, %v1993_v60 }
 0x88a   :  { %v2039_v63 = vadd.f32 %v2038_v55, %v2016_v37 }
 0x88b   :  { %v2058_v40 = vpop.f32.mrf.mxu0 }
 0x88c   :  { %v2059_v12 = vadd.f32 %v2058_v40, %v2036_v61 }
 0x88d   :  { %v2084_v24 = vpop.f32.mrf.mxu1 }
 0x88e   :  { %v2082_v53 = vadd.f32 %v2081_v62, %v2059_v12 }
 0x890   :  { %v2088_v9 = vadd.f32 %v2082_v53, %v2709_v6 }
 0x892   :  { %2092 = vst [vmem:[#allocation7 + $0x8] sm:$0xff] %v2088_v9 }
 0x893   :  { %v2061_v2 = vpop.f32.mrf.mxu0 }
 0x894   :  { %v2062_v7 = vadd.f32 %v2061_v2, %v2039_v63 }
 0x896   :  { %v2085_v25 = vadd.f32 %v2084_v24, %v2062_v7 }
 0x898   :  { %v2090_v41 = vadd.f32 %v2085_v25, %v2717_v13 }
 0x89a   :  { %2094 = vst [vmem:[#allocation7 + $0x18] sm:$0xff] %v2090_v41 }
 0x89b   :  { %2107 = dma.vmem_to_hbm [thread:$0]  %s2100_s3, 512, %s2102_s1, [#allocation4], %s2253_s20, %s2253_s20, %s2254_s21  }
 0x89c   :  { %2247 = dma.done.wait [#allocation4], 512  }
 0x89d   :  { %2248 = vsyncadd [#allocation4], 4294966784 }
 0x89e   :  { %2112 = vsyncpa [#allocation3], 1 }
 0x89f   :  { %2113 = vsyncpa [#allocation6], 1 }
 0x8a0   :  { %2114 = vsyncpa [#allocation4], 1 }

</bundles_post_ra>
